<compile_context>
chip_gen: v5e
topology: v5e:2x2
jax: 0.10.0
libtpu: 0.0.40
codegen_flags: <defaults>
</compile_context>

<pallas_src>
import numpy as np
import jax
import jax.numpy as jnp
from jax import lax
from jax.experimental import pallas as pl
from jax.experimental.pallas import tpu as pltpu

LN_EPS = 1e-5
K = 2            # unfold_kernel_size
K2 = K * K       # 4
K4 = K2 * K2     # 16
_SQRT_HALF = 0.7071067811865476


def _roundup(v, m):
    return ((v + m - 1) // m) * m


# ----------------------------- in-kernel math helpers -----------------------------

def _erf(z):
    # Abramowitz & Stegun 7.1.26, max abs error ~1.5e-7 (VPU/EUP-only ops)
    a1, a2, a3, a4, a5 = (0.254829592, -0.284496736, 1.421413741,
                          -1.453152027, 1.061405429)
    pcoef = 0.3275911
    sgn = jnp.where(z >= 0, 1.0, -1.0)
    az = jnp.abs(z)
    t = 1.0 / (1.0 + pcoef * az)
    poly = ((((a5 * t + a4) * t + a3) * t + a2) * t + a1) * t
    return sgn * (1.0 - poly * jnp.exp(-az * az))


def _gelu(z):
    # PyTorch nn.GELU default: exact erf formulation
    return 0.5 * z * (1.0 + _erf(z * _SQRT_HALF))


def _layernorm(t):
    """LayerNorm over the whole 2-D slab. Two-pass: mean, then centered variance."""
    n = t.shape[0] * t.shape[1]
    mean = jnp.sum(jnp.sum(t, axis=1, keepdims=True), axis=0, keepdims=True) * (1.0 / n)
    cen = t - mean
    var = jnp.sum(jnp.sum(cen * cen, axis=1, keepdims=True), axis=0, keepdims=True) * (1.0 / n)
    return cen * lax.rsqrt(var + LN_EPS)


def _cm_matmul(w, x, bias):
    """Channel-major (Co,Ci) @ (Ci,N) + bias as Ci unrolled rank-1 VPU FMAs.

    Only used for the contraction-4 products (conv2d_1 / linear1 / BMM); an MXU
    pass there would be <2% utilized and pay push/drain latency."""
    ci = x.shape[0]
    acc = w[:, 0:1] * x[0:1, :]
    for i in range(1, ci):
        acc = acc + w[:, i:i + 1] * x[i:i + 1, :]
    return acc + bias


# ----------------------------------- fused kernel ----------------------------------

def csa_fused_kernel(x_ref, wp_ref, o_ref):
    """Whole CSA forward for one sample, fully VMEM-resident.

    x_ref : (1, c,  K2*L) raw input, blocked pixel order (column q*L+l == pixel
                          (2*oh+kh, 2*ow+kw), q = kh*2+kw, l = oh*(w/2)+ow)
    wp_ref: (rows, 128)   single packed weight slab (see pack_params)
    o_ref : (1, c*c, K2*L) output in the same blocked order (lane-dense 256)
    """
    x = x_ref[0]                                               # (c, N) raw
    c, n = x.shape
    C2 = o_ref.shape[1]
    L = n // K2
    r0 = _roundup(max(c, K4, C2), 8)                           # row offset of Mlp weights

    # --- unpack the single weight slab (static slices, tiny) ---
    w1  = wp_ref[0:c,  0:c]                                    # conv2d_1 (1x1, stride 2)
    wl  = wp_ref[0:K4, c:2 * c]                                # linear1
    wb  = wp_ref[0:C2, 2 * c:3 * c]                            # BMM (1x1 conv)
    b1  = wp_ref[0:c,  3 * c:3 * c + 1]
    bl  = wp_ref[0:K4, 3 * c + 1:3 * c + 2]
    bb  = wp_ref[0:C2, 3 * c + 2:3 * c + 3]
    bf1 = wp_ref[0:C2, 3 * c + 3:3 * c + 4]
    bf2 = wp_ref[0:C2, 3 * c + 4:3 * c + 5]
    wf1 = wp_ref[r0:r0 + C2, 0:C2]                             # Mlp.fc1
    wf2 = wp_ref[r0 + C2:r0 + 2 * C2, 0:C2]                    # Mlp.fc2

    # --- LayerNorm over the whole (c,h,w) sample (stats are permutation-invariant) ---
    xn = _layernorm(x)

    # --- similarity branch on the RAW input: 1x1 stride-2 conv == the q=0 columns ---
    x0 = x[:, :L]                                              # (c, L)
    s1 = _cm_matmul(w1, x0, b1)                                # (c, L)   conv2d_1
    sim = _cm_matmul(wl, s1, bl)                               # (K4, L)  linear1, row p*K2+q

    # --- BMM branch (1x1 conv) on LN'd input: all K2 patch offsets in ONE product ---
    pv = _cm_matmul(wb, xn, bb)                                # (C2, N)

    # --- torch.bmm + F.fold on full 256-lane slabs:
    #       y[ch, p*L+l] = sum_q sim[K2*p+q, l] * pv[ch, q*L+l]
    #                    = sum_d sel_d[p*L+l] * roll(pv, -d*L)[ch, p*L+l]
    #     with sel_d[p*L+l] = sim[K2*p + (p+d)%K2, l]; rolls run on the XLU and
    #     only the 1-sublane sim tensor needs 64-lane assembly. ---
    sim_rows = [sim[j:j + 1, :] for j in range(K4)]            # hoisted slices
    y = None
    for d in range(K2):
        sel = jnp.concatenate(
            [sim_rows[K2 * p + (p + d) % K2] for p in range(K2)], axis=1)    # (1, N)
        pvd = pv if d == 0 else pltpu.roll(pv, shift=(K2 - d) * L, axis=1)   # lane roll
        term = sel * pvd
        y = term if y is None else y + term                    # (C2, N) == folded

    # --- residual: einops repeat 'b c h w -> b (repeat c) h w' == channel tiling ---
    x2 = y + jnp.concatenate([x] * (C2 // c), axis=0)          # (C2, N)

    # --- LayerNorm + per-pixel Mlp (fc1/GELU/fc2 on the MXU, exact-f32) + residual ---
    xn2 = _layernorm(x2)
    h1 = _gelu(jnp.dot(wf1, xn2, preferred_element_type=jnp.float32,
                       precision=lax.Precision.HIGHEST) + bf1)
    # TODO(synk): Mlp's nn.Dropout(0.5) is implemented as eval-mode identity.
    h2 = jnp.dot(wf2, h1, preferred_element_type=jnp.float32,
                 precision=lax.Precision.HIGHEST) + bf2
    o_ref[0] = h2 + x2


# --------------------------------- wrapper (glue) ----------------------------------

def init_params(key, c):
    C2 = c * c
    ks = jax.random.split(key, 10)

    def w(k, shape, scale=0.3):
        return (scale * jax.random.normal(k, shape)).astype(jnp.float32)

    return dict(
        W1=w(ks[0], (c, c)),    b1=w(ks[1], (c,), 0.1),        # conv2d_1 (1x1, stride 2)
        Wl=w(ks[2], (K4, c)),   bl=w(ks[3], (K4,), 0.1),       # linear1
        Wb=w(ks[4], (C2, c)),   bb=w(ks[5], (C2,), 0.1),       # BMM (1x1 conv)
        Wf1=w(ks[6], (C2, C2)), bf1=w(ks[7], (C2,), 0.1),      # Mlp.fc1
        Wf2=w(ks[8], (C2, C2)), bf2=w(ks[9], (C2,), 0.1),      # Mlp.fc2
    )


def pack_params(p, c):
    """Pack all 10 weight/bias tensors into ONE 128-lane-padded f32 slab (one DMA)."""
    C2 = c * c
    r0 = _roundup(max(c, K4, C2), 8)
    rows = _roundup(r0 + 2 * C2, 8)
    cols = _roundup(max(3 * c + 5, C2), 128)
    wp = np.zeros((rows, cols), np.float32)
    wp[0:c,  0:c] = np.asarray(p["W1"])
    wp[0:K4, c:2 * c] = np.asarray(p["Wl"])
    wp[0:C2, 2 * c:3 * c] = np.asarray(p["Wb"])
    wp[0:c,  3 * c] = np.asarray(p["b1"])
    wp[0:K4, 3 * c + 1] = np.asarray(p["bl"])
    wp[0:C2, 3 * c + 2] = np.asarray(p["bb"])
    wp[0:C2, 3 * c + 3] = np.asarray(p["bf1"])
    wp[0:C2, 3 * c + 4] = np.asarray(p["bf2"])
    wp[r0:r0 + C2, 0:C2] = np.asarray(p["Wf1"])
    wp[r0 + C2:r0 + 2 * C2, 0:C2] = np.asarray(p["Wf2"])
    return jnp.asarray(wp)


def csa_forward(x, wpack):
    # The PyTorch module's _unfold hard-codes batch=1 (x.view(1, ...)); per-sample
    # semantics are identical, so independent samples are folded into a "parallel"
    # grid axis (feeds both v7x TensorCores, hides/amortizes DMAs).
    b, c, h, w = x.shape
    h2, w2 = h // 2, w // 2
    L = h2 * w2
    C2 = c * c
    N = K2 * L                       # == h * w
    f32 = jnp.float32
    x = x.astype(f32)

    # Blocked pixel layout: column q*L + l  <->  pixel (2*oh+kh, 2*ow+kw).
    x_blk = x.reshape(b, c, h2, K, w2, K).transpose(0, 1, 3, 5, 2, 4).reshape(b, c, N)

    flops = b * (2 * c * c * L + 2 * K4 * c * L + 2 * C2 * c * N
                 + 2 * C2 * K2 * N + 4 * C2 * C2 * N + 12 * C2 * N)
    cost = pl.CostEstimate(
        flops=int(flops),
        transcendentals=int(b * C2 * N),            # exp inside the GELU erf approx
        bytes_accessed=int(4 * (b * (c * N + 2 * C2 * N) + wpack.size)))

    # TODO(synk): for large c/h/w the whole-sample-in-VMEM design must be re-tiled
    # (grid over pixel chunks + two-pass LN across tiles), sized for v7x's 64 MiB
    # VMEM; at the sizes this module targets a sample is only a few KiB.
    out_blk = pl.pallas_call(
        csa_fused_kernel,
        out_shape=jax.ShapeDtypeStruct((b, C2, N), f32),
        grid=(b,),
        in_specs=[
            pl.BlockSpec((1, c, N), lambda i: (i, 0, 0)),
            pl.BlockSpec(wpack.shape, lambda i: (0, 0)),   # constant block -> 1 DMA total
        ],
        out_specs=pl.BlockSpec((1, C2, N), lambda i: (i, 0, 0)),
        compiler_params=pltpu.CompilerParams(dimension_semantics=("parallel",)),
        cost_estimate=cost,
    )(x_blk, wpack)

    # Undo the blocked pixel order (== F.fold's spatial interleave).  If the consumer
    # is layout-agnostic (e.g. a chained CSA), this un-blocking (and the x_blk
    # blocking above) could be dropped to save an XLA op + an HBM round trip.
    return out_blk.reshape(b, C2, K, K, h2, w2).transpose(0, 1, 4, 2, 5, 3).reshape(b, C2, h, w)


# ------------------------------ pure-JAX reference ---------------------------------

def csa_reference(x, p):
    P = lax.Precision.HIGHEST
    b, c, h, w = x.shape
    h2, w2 = h // 2, w // 2
    L = h2 * w2
    C2 = c * c

    def ln(t):
        m = jnp.mean(t, axis=(1, 2, 3), keepdims=True)
        v = jnp.mean((t - m) ** 2, axis=(1, 2, 3), keepdims=True)
        return (t - m) / jnp.sqrt(v + LN_EPS)

    xn = ln(x)
    xu = xn.reshape(b, c, h2, K, w2, K).transpose(0, 2, 4, 3, 5, 1).reshape(b, L, K2, c)
    s0 = x[:, :, ::2, ::2].transpose(0, 2, 3, 1).reshape(b, L, c)
    s1 = jnp.matmul(s0, p["W1"].T, precision=P) + p["b1"]
    sim = (jnp.matmul(s1, p["Wl"].T, precision=P) + p["bl"]).reshape(b, L, K2, K2)
    pv = jnp.matmul(xu, p["Wb"].T, precision=P) + p["bb"]                  # (b, L, K2, C2)
    y = jnp.einsum("blpq,blqc->blpc", sim, pv, precision=P)
    folded = y.reshape(b, h2, w2, K, K, C2).transpose(0, 5, 1, 3, 2, 4).reshape(b, C2, h, w)
    x2 = folded + jnp.tile(x, (1, c, 1, 1))
    t = ln(x2).transpose(0, 2, 3, 1)
    h1 = jnp.matmul(t, p["Wf1"].T, precision=P) + p["bf1"]
    h1 = 0.5 * h1 * (1.0 + jax.scipy.special.erf(h1 * _SQRT_HALF))
    out = (jnp.matmul(h1, p["Wf2"].T, precision=P) + p["bf2"]).transpose(0, 3, 1, 2)
    return out + x2


if __name__ == "__main__":
    key = jax.random.PRNGKey(0)
    kx, kp = jax.random.split(key)
    b, c, h, w = 2, 4, 16, 16          # pre_ch=4 -> out_ch=16; batch -> parallel grid steps
    x = jax.random.normal(kx, (b, c, h, w), dtype=jnp.float32)
    params = init_params(kp, c)
    wpack = pack_params(params, c)     # one-time weight layout prep (single packed slab)

    fwd = jax.jit(csa_forward)
    out = jax.block_until_ready(fwd(x, wpack))
    assert out.shape == (b, c * c, h, w), out.shape

    ref = jax.block_until_ready(csa_reference(x, params))
    np.testing.assert_allclose(np.asarray(out), np.asarray(ref), rtol=1e-3, atol=1e-3)
    print("KERNEL_OK")
</pallas_src>

<mosaic_0001>
module attributes {stable_mosaic.version = 11 : i64} {
  func.func @csa_fused_kernel(%arg0: i32, %arg1: memref<1x4x256xf32, #tpu.memory_space<vmem>>, %arg2: memref<48x128xf32, #tpu.memory_space<vmem>>, %arg3: memref<1x16x256xf32, #tpu.memory_space<vmem>>) attributes {dimension_semantics = [#tpu.dimension_semantics<parallel>], iteration_bounds = array<i64: 2>, scalar_prefetch = 0 : i64, scratch_operands = 0 : i64, tpu.core_type = #tpu.core_type<tc>, window_params = [{transform_indices = @transform_0, window_bounds = array<i64: 1, 4, 256>}, {pipeline_mode = #tpu.pipeline_mode<synchronous>, transform_indices = @transform_1, window_bounds = array<i64: 48, 128>}, {transform_indices = @transform_2, window_bounds = array<i64: 1, 16, 256>}]} {
    %c0 = arith.constant 0 : index
    %c0_0 = arith.constant 0 : index
    %c0_1 = arith.constant 0 : index
    %0 = vector.load %arg1[%c0, %c0_0, %c0_1] : memref<1x4x256xf32, #tpu.memory_space<vmem>>, vector<1x4x256xf32>
    %1 = vector.shape_cast %0 : vector<1x4x256xf32> to vector<4x256xf32>
    %c0_2 = arith.constant 0 : index
    %c0_3 = arith.constant 0 : index
    %2 = vector.load %arg2[%c0_2, %c0_3] : memref<48x128xf32, #tpu.memory_space<vmem>>, vector<4x4xf32>
    %c0_4 = arith.constant 0 : index
    %c4 = arith.constant 4 : index
    %3 = vector.load %arg2[%c0_4, %c4] : memref<48x128xf32, #tpu.memory_space<vmem>>, vector<16x4xf32>
    %c0_5 = arith.constant 0 : index
    %c8 = arith.constant 8 : index
    %4 = vector.load %arg2[%c0_5, %c8] : memref<48x128xf32, #tpu.memory_space<vmem>>, vector<16x4xf32>
    %c0_6 = arith.constant 0 : index
    %c12 = arith.constant 12 : index
    %5 = vector.load %arg2[%c0_6, %c12] : memref<48x128xf32, #tpu.memory_space<vmem>>, vector<4x1xf32>
    %c0_7 = arith.constant 0 : index
    %c13 = arith.constant 13 : index
    %6 = vector.load %arg2[%c0_7, %c13] : memref<48x128xf32, #tpu.memory_space<vmem>>, vector<16x1xf32>
    %c0_8 = arith.constant 0 : index
    %c14 = arith.constant 14 : index
    %7 = vector.load %arg2[%c0_8, %c14] : memref<48x128xf32, #tpu.memory_space<vmem>>, vector<16x1xf32>
    %c0_9 = arith.constant 0 : index
    %c15 = arith.constant 15 : index
    %8 = vector.load %arg2[%c0_9, %c15] : memref<48x128xf32, #tpu.memory_space<vmem>>, vector<16x1xf32>
    %c0_10 = arith.constant 0 : index
    %c16 = arith.constant 16 : index
    %9 = vector.load %arg2[%c0_10, %c16] : memref<48x128xf32, #tpu.memory_space<vmem>>, vector<16x1xf32>
    %c16_11 = arith.constant 16 : index
    %c0_12 = arith.constant 0 : index
    %10 = vector.load %arg2[%c16_11, %c0_12] : memref<48x128xf32, #tpu.memory_space<vmem>>, vector<16x16xf32>
    %c32 = arith.constant 32 : index
    %c0_13 = arith.constant 0 : index
    %11 = vector.load %arg2[%c32, %c0_13] : memref<48x128xf32, #tpu.memory_space<vmem>>, vector<16x16xf32>
    %cst = arith.constant dense<0.000000e+00> : vector<4xf32>
    %12 = vector.multi_reduction <add>, %1, %cst [1] : vector<4x256xf32> to vector<4xf32>
    %13 = vector.shape_cast %12 : vector<4xf32> to vector<4x1xf32>
    %cst_14 = arith.constant dense<0.000000e+00> : vector<1xf32>
    %14 = vector.multi_reduction <add>, %13, %cst_14 [0] : vector<4x1xf32> to vector<1xf32>
    %15 = vector.shape_cast %14 : vector<1xf32> to vector<1x1xf32>
    %cst_15 = arith.constant 9.765625E-4 : f32
    %16 = vector.broadcast %cst_15 : f32 to vector<1x1xf32>
    %17 = arith.mulf %15, %16 : vector<1x1xf32>
    %18 = vector.broadcast %17 : vector<1x1xf32> to vector<4x256xf32>
    %19 = arith.subf %1, %18 : vector<4x256xf32>
    %20 = arith.mulf %19, %19 : vector<4x256xf32>
    %cst_16 = arith.constant dense<0.000000e+00> : vector<4xf32>
    %21 = vector.multi_reduction <add>, %20, %cst_16 [1] : vector<4x256xf32> to vector<4xf32>
    %22 = vector.shape_cast %21 : vector<4xf32> to vector<4x1xf32>
    %cst_17 = arith.constant dense<0.000000e+00> : vector<1xf32>
    %23 = vector.multi_reduction <add>, %22, %cst_17 [0] : vector<4x1xf32> to vector<1xf32>
    %24 = vector.shape_cast %23 : vector<1xf32> to vector<1x1xf32>
    %cst_18 = arith.constant 9.765625E-4 : f32
    %25 = vector.broadcast %cst_18 : f32 to vector<1x1xf32>
    %26 = arith.mulf %24, %25 : vector<1x1xf32>
    %cst_19 = arith.constant 9.99999974E-6 : f32
    %27 = vector.broadcast %cst_19 : f32 to vector<1x1xf32>
    %28 = arith.addf %26, %27 : vector<1x1xf32>
    %29 = math.rsqrt %28 : vector<1x1xf32>
    %30 = vector.broadcast %29 : vector<1x1xf32> to vector<4x256xf32>
    %31 = arith.mulf %19, %30 : vector<4x256xf32>
    %32 = vector.extract_strided_slice %1 {offsets = [0, 0], sizes = [4, 64], strides = [1, 1]} : vector<4x256xf32> to vector<4x64xf32>
    %33 = vector.extract_strided_slice %2 {offsets = [0, 0], sizes = [4, 1], strides = [1, 1]} : vector<4x4xf32> to vector<4x1xf32>
    %34 = vector.extract_strided_slice %32 {offsets = [0, 0], sizes = [1, 64], strides = [1, 1]} : vector<4x64xf32> to vector<1x64xf32>
    %35 = vector.broadcast %33 : vector<4x1xf32> to vector<4x64xf32>
    %36 = vector.broadcast %34 : vector<1x64xf32> to vector<4x64xf32>
    %37 = arith.mulf %35, %36 : vector<4x64xf32>
    %38 = vector.extract_strided_slice %2 {offsets = [0, 1], sizes = [4, 1], strides = [1, 1]} : vector<4x4xf32> to vector<4x1xf32>
    %39 = vector.extract_strided_slice %32 {offsets = [1, 0], sizes = [1, 64], strides = [1, 1]} : vector<4x64xf32> to vector<1x64xf32>
    %40 = vector.broadcast %38 : vector<4x1xf32> to vector<4x64xf32>
    %41 = vector.broadcast %39 : vector<1x64xf32> to vector<4x64xf32>
    %42 = arith.mulf %40, %41 : vector<4x64xf32>
    %43 = arith.addf %37, %42 : vector<4x64xf32>
    %44 = vector.extract_strided_slice %2 {offsets = [0, 2], sizes = [4, 1], strides = [1, 1]} : vector<4x4xf32> to vector<4x1xf32>
    %45 = vector.extract_strided_slice %32 {offsets = [2, 0], sizes = [1, 64], strides = [1, 1]} : vector<4x64xf32> to vector<1x64xf32>
    %46 = vector.broadcast %44 : vector<4x1xf32> to vector<4x64xf32>
    %47 = vector.broadcast %45 : vector<1x64xf32> to vector<4x64xf32>
    %48 = arith.mulf %46, %47 : vector<4x64xf32>
    %49 = arith.addf %43, %48 : vector<4x64xf32>
    %50 = vector.extract_strided_slice %2 {offsets = [0, 3], sizes = [4, 1], strides = [1, 1]} : vector<4x4xf32> to vector<4x1xf32>
    %51 = vector.extract_strided_slice %32 {offsets = [3, 0], sizes = [1, 64], strides = [1, 1]} : vector<4x64xf32> to vector<1x64xf32>
    %52 = vector.broadcast %50 : vector<4x1xf32> to vector<4x64xf32>
    %53 = vector.broadcast %51 : vector<1x64xf32> to vector<4x64xf32>
    %54 = arith.mulf %52, %53 : vector<4x64xf32>
    %55 = arith.addf %49, %54 : vector<4x64xf32>
    %56 = vector.broadcast %5 : vector<4x1xf32> to vector<4x64xf32>
    %57 = arith.addf %55, %56 : vector<4x64xf32>
    %58 = vector.extract_strided_slice %3 {offsets = [0, 0], sizes = [16, 1], strides = [1, 1]} : vector<16x4xf32> to vector<16x1xf32>
    %59 = vector.extract_strided_slice %57 {offsets = [0, 0], sizes = [1, 64], strides = [1, 1]} : vector<4x64xf32> to vector<1x64xf32>
    %60 = vector.broadcast %58 : vector<16x1xf32> to vector<16x64xf32>
    %61 = vector.broadcast %59 : vector<1x64xf32> to vector<16x64xf32>
    %62 = arith.mulf %60, %61 : vector<16x64xf32>
    %63 = vector.extract_strided_slice %3 {offsets = [0, 1], sizes = [16, 1], strides = [1, 1]} : vector<16x4xf32> to vector<16x1xf32>
    %64 = vector.extract_strided_slice %57 {offsets = [1, 0], sizes = [1, 64], strides = [1, 1]} : vector<4x64xf32> to vector<1x64xf32>
    %65 = vector.broadcast %63 : vector<16x1xf32> to vector<16x64xf32>
    %66 = vector.broadcast %64 : vector<1x64xf32> to vector<16x64xf32>
    %67 = arith.mulf %65, %66 : vector<16x64xf32>
    %68 = arith.addf %62, %67 : vector<16x64xf32>
    %69 = vector.extract_strided_slice %3 {offsets = [0, 2], sizes = [16, 1], strides = [1, 1]} : vector<16x4xf32> to vector<16x1xf32>
    %70 = vector.extract_strided_slice %57 {offsets = [2, 0], sizes = [1, 64], strides = [1, 1]} : vector<4x64xf32> to vector<1x64xf32>
    %71 = vector.broadcast %69 : vector<16x1xf32> to vector<16x64xf32>
    %72 = vector.broadcast %70 : vector<1x64xf32> to vector<16x64xf32>
    %73 = arith.mulf %71, %72 : vector<16x64xf32>
    %74 = arith.addf %68, %73 : vector<16x64xf32>
    %75 = vector.extract_strided_slice %3 {offsets = [0, 3], sizes = [16, 1], strides = [1, 1]} : vector<16x4xf32> to vector<16x1xf32>
    %76 = vector.extract_strided_slice %57 {offsets = [3, 0], sizes = [1, 64], strides = [1, 1]} : vector<4x64xf32> to vector<1x64xf32>
    %77 = vector.broadcast %75 : vector<16x1xf32> to vector<16x64xf32>
    %78 = vector.broadcast %76 : vector<1x64xf32> to vector<16x64xf32>
    %79 = arith.mulf %77, %78 : vector<16x64xf32>
    %80 = arith.addf %74, %79 : vector<16x64xf32>
    %81 = vector.broadcast %6 : vector<16x1xf32> to vector<16x64xf32>
    %82 = arith.addf %80, %81 : vector<16x64xf32>
    %83 = vector.extract_strided_slice %4 {offsets = [0, 0], sizes = [16, 1], strides = [1, 1]} : vector<16x4xf32> to vector<16x1xf32>
    %84 = vector.extract_strided_slice %31 {offsets = [0, 0], sizes = [1, 256], strides = [1, 1]} : vector<4x256xf32> to vector<1x256xf32>
    %85 = vector.broadcast %83 : vector<16x1xf32> to vector<16x256xf32>
    %86 = vector.broadcast %84 : vector<1x256xf32> to vector<16x256xf32>
    %87 = arith.mulf %85, %86 : vector<16x256xf32>
    %88 = vector.extract_strided_slice %4 {offsets = [0, 1], sizes = [16, 1], strides = [1, 1]} : vector<16x4xf32> to vector<16x1xf32>
    %89 = vector.extract_strided_slice %31 {offsets = [1, 0], sizes = [1, 256], strides = [1, 1]} : vector<4x256xf32> to vector<1x256xf32>
    %90 = vector.broadcast %88 : vector<16x1xf32> to vector<16x256xf32>
    %91 = vector.broadcast %89 : vector<1x256xf32> to vector<16x256xf32>
    %92 = arith.mulf %90, %91 : vector<16x256xf32>
    %93 = arith.addf %87, %92 : vector<16x256xf32>
    %94 = vector.extract_strided_slice %4 {offsets = [0, 2], sizes = [16, 1], strides = [1, 1]} : vector<16x4xf32> to vector<16x1xf32>
    %95 = vector.extract_strided_slice %31 {offsets = [2, 0], sizes = [1, 256], strides = [1, 1]} : vector<4x256xf32> to vector<1x256xf32>
    %96 = vector.broadcast %94 : vector<16x1xf32> to vector<16x256xf32>
    %97 = vector.broadcast %95 : vector<1x256xf32> to vector<16x256xf32>
    %98 = arith.mulf %96, %97 : vector<16x256xf32>
    %99 = arith.addf %93, %98 : vector<16x256xf32>
    %100 = vector.extract_strided_slice %4 {offsets = [0, 3], sizes = [16, 1], strides = [1, 1]} : vector<16x4xf32> to vector<16x1xf32>
    %101 = vector.extract_strided_slice %31 {offsets = [3, 0], sizes = [1, 256], strides = [1, 1]} : vector<4x256xf32> to vector<1x256xf32>
    %102 = vector.broadcast %100 : vector<16x1xf32> to vector<16x256xf32>
    %103 = vector.broadcast %101 : vector<1x256xf32> to vector<16x256xf32>
    %104 = arith.mulf %102, %103 : vector<16x256xf32>
    %105 = arith.addf %99, %104 : vector<16x256xf32>
    %106 = vector.broadcast %7 : vector<16x1xf32> to vector<16x256xf32>
    %107 = arith.addf %105, %106 : vector<16x256xf32>
    %108 = vector.extract_strided_slice %82 {offsets = [0, 0], sizes = [1, 64], strides = [1, 1]} : vector<16x64xf32> to vector<1x64xf32>
    %109 = vector.extract_strided_slice %82 {offsets = [1, 0], sizes = [1, 64], strides = [1, 1]} : vector<16x64xf32> to vector<1x64xf32>
    %110 = vector.extract_strided_slice %82 {offsets = [2, 0], sizes = [1, 64], strides = [1, 1]} : vector<16x64xf32> to vector<1x64xf32>
    %111 = vector.extract_strided_slice %82 {offsets = [3, 0], sizes = [1, 64], strides = [1, 1]} : vector<16x64xf32> to vector<1x64xf32>
    %112 = vector.extract_strided_slice %82 {offsets = [4, 0], sizes = [1, 64], strides = [1, 1]} : vector<16x64xf32> to vector<1x64xf32>
    %113 = vector.extract_strided_slice %82 {offsets = [5, 0], sizes = [1, 64], strides = [1, 1]} : vector<16x64xf32> to vector<1x64xf32>
    %114 = vector.extract_strided_slice %82 {offsets = [6, 0], sizes = [1, 64], strides = [1, 1]} : vector<16x64xf32> to vector<1x64xf32>
    %115 = vector.extract_strided_slice %82 {offsets = [7, 0], sizes = [1, 64], strides = [1, 1]} : vector<16x64xf32> to vector<1x64xf32>
    %116 = vector.extract_strided_slice %82 {offsets = [8, 0], sizes = [1, 64], strides = [1, 1]} : vector<16x64xf32> to vector<1x64xf32>
    %117 = vector.extract_strided_slice %82 {offsets = [9, 0], sizes = [1, 64], strides = [1, 1]} : vector<16x64xf32> to vector<1x64xf32>
    %118 = vector.extract_strided_slice %82 {offsets = [10, 0], sizes = [1, 64], strides = [1, 1]} : vector<16x64xf32> to vector<1x64xf32>
    %119 = vector.extract_strided_slice %82 {offsets = [11, 0], sizes = [1, 64], strides = [1, 1]} : vector<16x64xf32> to vector<1x64xf32>
    %120 = vector.extract_strided_slice %82 {offsets = [12, 0], sizes = [1, 64], strides = [1, 1]} : vector<16x64xf32> to vector<1x64xf32>
    %121 = vector.extract_strided_slice %82 {offsets = [13, 0], sizes = [1, 64], strides = [1, 1]} : vector<16x64xf32> to vector<1x64xf32>
    %122 = vector.extract_strided_slice %82 {offsets = [14, 0], sizes = [1, 64], strides = [1, 1]} : vector<16x64xf32> to vector<1x64xf32>
    %123 = vector.extract_strided_slice %82 {offsets = [15, 0], sizes = [1, 64], strides = [1, 1]} : vector<16x64xf32> to vector<1x64xf32>
    %124 = tpu.concatenate %108, %113, %118, %123 in 1 : vector<1x64xf32>, vector<1x64xf32>, vector<1x64xf32>, vector<1x64xf32> -> vector<1x256xf32>
    %125 = vector.broadcast %124 : vector<1x256xf32> to vector<16x256xf32>
    %126 = arith.mulf %125, %107 : vector<16x256xf32>
    %127 = tpu.concatenate %109, %114, %119, %120 in 1 : vector<1x64xf32>, vector<1x64xf32>, vector<1x64xf32>, vector<1x64xf32> -> vector<1x256xf32>
    %c192_i32 = arith.constant 192 : i32
    %128 = tpu.dynamic_rotate %107 by %c192_i32 dim 1 : vector<16x256xf32>, i32 -> vector<16x256xf32>
    %129 = vector.broadcast %127 : vector<1x256xf32> to vector<16x256xf32>
    %130 = arith.mulf %129, %128 : vector<16x256xf32>
    %131 = arith.addf %126, %130 : vector<16x256xf32>
    %132 = tpu.concatenate %110, %115, %116, %121 in 1 : vector<1x64xf32>, vector<1x64xf32>, vector<1x64xf32>, vector<1x64xf32> -> vector<1x256xf32>
    %c128_i32 = arith.constant 128 : i32
    %133 = tpu.dynamic_rotate %107 by %c128_i32 dim 1 : vector<16x256xf32>, i32 -> vector<16x256xf32>
    %134 = vector.broadcast %132 : vector<1x256xf32> to vector<16x256xf32>
    %135 = arith.mulf %134, %133 : vector<16x256xf32>
    %136 = arith.addf %131, %135 : vector<16x256xf32>
    %137 = tpu.concatenate %111, %112, %117, %122 in 1 : vector<1x64xf32>, vector<1x64xf32>, vector<1x64xf32>, vector<1x64xf32> -> vector<1x256xf32>
    %c64_i32 = arith.constant 64 : i32
    %138 = tpu.dynamic_rotate %107 by %c64_i32 dim 1 : vector<16x256xf32>, i32 -> vector<16x256xf32>
    %139 = vector.broadcast %137 : vector<1x256xf32> to vector<16x256xf32>
    %140 = arith.mulf %139, %138 : vector<16x256xf32>
    %141 = arith.addf %136, %140 : vector<16x256xf32>
    %142 = tpu.concatenate %1, %1, %1, %1 in 0 : vector<4x256xf32>, vector<4x256xf32>, vector<4x256xf32>, vector<4x256xf32> -> vector<16x256xf32>
    %143 = arith.addf %141, %142 : vector<16x256xf32>
    %cst_20 = arith.constant dense<0.000000e+00> : vector<16xf32>
    %144 = vector.multi_reduction <add>, %143, %cst_20 [1] : vector<16x256xf32> to vector<16xf32>
    %145 = vector.shape_cast %144 : vector<16xf32> to vector<16x1xf32>
    %cst_21 = arith.constant dense<0.000000e+00> : vector<1xf32>
    %146 = vector.multi_reduction <add>, %145, %cst_21 [0] : vector<16x1xf32> to vector<1xf32>
    %147 = vector.shape_cast %146 : vector<1xf32> to vector<1x1xf32>
    %cst_22 = arith.constant 2.44140625E-4 : f32
    %148 = vector.broadcast %cst_22 : f32 to vector<1x1xf32>
    %149 = arith.mulf %147, %148 : vector<1x1xf32>
    %150 = vector.broadcast %149 : vector<1x1xf32> to vector<16x256xf32>
    %151 = arith.subf %143, %150 : vector<16x256xf32>
    %152 = arith.mulf %151, %151 : vector<16x256xf32>
    %cst_23 = arith.constant dense<0.000000e+00> : vector<16xf32>
    %153 = vector.multi_reduction <add>, %152, %cst_23 [1] : vector<16x256xf32> to vector<16xf32>
    %154 = vector.shape_cast %153 : vector<16xf32> to vector<16x1xf32>
    %cst_24 = arith.constant dense<0.000000e+00> : vector<1xf32>
    %155 = vector.multi_reduction <add>, %154, %cst_24 [0] : vector<16x1xf32> to vector<1xf32>
    %156 = vector.shape_cast %155 : vector<1xf32> to vector<1x1xf32>
    %cst_25 = arith.constant 2.44140625E-4 : f32
    %157 = vector.broadcast %cst_25 : f32 to vector<1x1xf32>
    %158 = arith.mulf %156, %157 : vector<1x1xf32>
    %cst_26 = arith.constant 9.99999974E-6 : f32
    %159 = vector.broadcast %cst_26 : f32 to vector<1x1xf32>
    %160 = arith.addf %158, %159 : vector<1x1xf32>
    %161 = math.rsqrt %160 : vector<1x1xf32>
    %162 = vector.broadcast %161 : vector<1x1xf32> to vector<16x256xf32>
    %163 = arith.mulf %151, %162 : vector<16x256xf32>
    %cst_27 = arith.constant dense<0.000000e+00> : vector<16x256xf32>
    %164 = tpu.matmul %10, %163, %cst_27 {dimension_numbers = #tpu.dot_dimension_numbers<[1], [0], [0], [1], [0, 0, 1, 1], [], []>, precision = #tpu.contract_precision<fp32>} : vector<16x16xf32>, vector<16x256xf32>, vector<16x256xf32> -> vector<16x256xf32>
    %165 = vector.broadcast %8 : vector<16x1xf32> to vector<16x256xf32>
    %166 = arith.addf %164, %165 : vector<16x256xf32>
    %cst_28 = arith.constant 5.000000e-01 : f32
    %167 = vector.broadcast %cst_28 : f32 to vector<16x256xf32>
    %168 = arith.mulf %167, %166 : vector<16x256xf32>
    %cst_29 = arith.constant 0.707106769 : f32
    %169 = vector.broadcast %cst_29 : f32 to vector<16x256xf32>
    %170 = arith.mulf %166, %169 : vector<16x256xf32>
    %cst_30 = arith.constant 0.000000e+00 : f32
    %171 = vector.broadcast %cst_30 : f32 to vector<16x256xf32>
    %172 = arith.cmpf oge, %170, %171 : vector<16x256xf32>
    %cst_31 = arith.constant 1.000000e+00 : f32
    %cst_32 = arith.constant -1.000000e+00 : f32
    %173 = vector.broadcast %cst_31 : f32 to vector<16x256xf32>
    %174 = vector.broadcast %cst_32 : f32 to vector<16x256xf32>
    %175 = arith.select %172, %173, %174 : vector<16x256xi1>, vector<16x256xf32>
    %176 = math.absf %170 : vector<16x256xf32>
    %cst_33 = arith.constant 0.327591091 : f32
    %177 = vector.broadcast %cst_33 : f32 to vector<16x256xf32>
    %178 = arith.mulf %177, %176 : vector<16x256xf32>
    %cst_34 = arith.constant 1.000000e+00 : f32
    %179 = vector.broadcast %cst_34 : f32 to vector<16x256xf32>
    %180 = arith.addf %179, %178 : vector<16x256xf32>
    %cst_35 = arith.constant 1.000000e+00 : f32
    %181 = vector.broadcast %cst_35 : f32 to vector<16x256xf32>
    %182 = arith.divf %181, %180 : vector<16x256xf32>
    %cst_36 = arith.constant 1.06140542 : f32
    %183 = vector.broadcast %cst_36 : f32 to vector<16x256xf32>
    %184 = arith.mulf %183, %182 : vector<16x256xf32>
    %cst_37 = arith.constant -1.45315206 : f32
    %185 = vector.broadcast %cst_37 : f32 to vector<16x256xf32>
    %186 = arith.addf %184, %185 : vector<16x256xf32>
    %187 = arith.mulf %186, %182 : vector<16x256xf32>
    %cst_38 = arith.constant 1.42141378 : f32
    %188 = vector.broadcast %cst_38 : f32 to vector<16x256xf32>
    %189 = arith.addf %187, %188 : vector<16x256xf32>
    %190 = arith.mulf %189, %182 : vector<16x256xf32>
    %cst_39 = arith.constant -0.284496725 : f32
    %191 = vector.broadcast %cst_39 : f32 to vector<16x256xf32>
    %192 = arith.addf %190, %191 : vector<16x256xf32>
    %193 = arith.mulf %192, %182 : vector<16x256xf32>
    %cst_40 = arith.constant 0.254829586 : f32
    %194 = vector.broadcast %cst_40 : f32 to vector<16x256xf32>
    %195 = arith.addf %193, %194 : vector<16x256xf32>
    %196 = arith.mulf %195, %182 : vector<16x256xf32>
    %cst_41 = arith.constant 0.000000e+00 : f32
    %197 = vector.broadcast %cst_41 : f32 to vector<16x256xf32>
    %198 = arith.subf %197, %176 : vector<16x256xf32>
    %199 = arith.mulf %198, %176 : vector<16x256xf32>
    %200 = math.exp %199 : vector<16x256xf32>
    %201 = arith.mulf %196, %200 : vector<16x256xf32>
    %cst_42 = arith.constant 1.000000e+00 : f32
    %202 = vector.broadcast %cst_42 : f32 to vector<16x256xf32>
    %203 = arith.subf %202, %201 : vector<16x256xf32>
    %204 = arith.mulf %175, %203 : vector<16x256xf32>
    %cst_43 = arith.constant 1.000000e+00 : f32
    %205 = vector.broadcast %cst_43 : f32 to vector<16x256xf32>
    %206 = arith.addf %205, %204 : vector<16x256xf32>
    %207 = arith.mulf %168, %206 : vector<16x256xf32>
    %cst_44 = arith.constant dense<0.000000e+00> : vector<16x256xf32>
    %208 = tpu.matmul %11, %207, %cst_44 {dimension_numbers = #tpu.dot_dimension_numbers<[1], [0], [0], [1], [0, 0, 1, 1], [], []>, precision = #tpu.contract_precision<fp32>} : vector<16x16xf32>, vector<16x256xf32>, vector<16x256xf32> -> vector<16x256xf32>
    %209 = vector.broadcast %9 : vector<16x1xf32> to vector<16x256xf32>
    %210 = arith.addf %208, %209 : vector<16x256xf32>
    %211 = arith.addf %210, %143 : vector<16x256xf32>
    %c0_45 = arith.constant 0 : index
    %c0_46 = arith.constant 0 : index
    %c0_47 = arith.constant 0 : index
    %212 = vector.load %arg3[%c0_45, %c0_46, %c0_47] : memref<1x16x256xf32, #tpu.memory_space<vmem>>, vector<1x16x256xf32>
    %213 = vector.shape_cast %212 : vector<1x16x256xf32> to vector<16x256xf32>
    %214 = vector.shape_cast %211 : vector<16x256xf32> to vector<1x16x256xf32>
    tpu.vector_store %arg3[%c0_45, %c0_46, %c0_47], %214 {strides = array<i32>} : memref<1x16x256xf32, #tpu.memory_space<vmem>>, vector<1x16x256xf32>,
    return
  }
  func.func @transform_0(%arg0: i32) -> (i32, i32, i32) {
    %c0_i32 = arith.constant 0 : i32
    %c0_i32_0 = arith.constant 0 : i32
    %c0_i32_1 = arith.constant 0 : i32
    return %arg0, %c0_i32, %c0_i32_0 : i32, i32, i32
  }
  func.func @transform_1(%arg0: i32) -> (i32, i32) {
    %c0_i32 = arith.constant 0 : i32
    %c0_i32_0 = arith.constant 0 : i32
    %c0_i32_1 = arith.constant 0 : i32
    return %c0_i32, %c0_i32_0 : i32, i32
  }
  func.func @transform_2(%arg0: i32) -> (i32, i32, i32) {
    %c0_i32 = arith.constant 0 : i32
    %c0_i32_0 = arith.constant 0 : i32
    %c0_i32_1 = arith.constant 0 : i32
    return %arg0, %c0_i32, %c0_i32_0 : i32, i32, i32
  }
}

</mosaic_0001>

<bundles_post_ra>
// kernel: csa_forward.1
= control target key start
LH: loop header
LB: loop body
LE: loop exit
PB: predicated region body
PF: predicated region fallthrough
CT: control target
= control target key end

     0   :  { %s1703_s9 = smov 0   ;;  %s2055_s0 = inlined_call_operand.vmem [shape: f32[2,4,256], index: 0, kind: input, shape index: {}]   ;;  %s2056_s1 = inlined_call_operand.vmem [shape: f32[48,128], index: 1, kind: input, shape index: {}]   ;;  %s2057_s2 = inlined_call_operand.vmem [shape: f32[2,16,256], index: 2, kind: output, shape index: {}]  }
   0x1 LB: > { %s1569_s10 = sadd.s32 4294967295, %s1667_s9   ;;  %p1573_p0 = scmp.ge.s32.totalorder %s1667_s9, 1  ;;  %s1667_s9 = sphi %s1703_s9, %s12_s9  }
   0x2   : > { %p112_p1 = scmp.lt.s32.totalorder %s1667_s9, 3 }
   0x4   : > { %p113_p2 = pnand %p1573_p0, %p112_p1 }
   0x5   : > { %p134_p3 = scmp.lt.s32.totalorder (!%p113_p2), %s1569_s10, 1  ;;  %s1684_s21 = smov (!%p113_p2), 64  }
   0x6   : > { %116 = sbr.rel (%p113_p2) target bundleno = 1181 (0x49d), region = 28 }
   0xb   : > { %v145_v0 = vld [vmem:[%s2056_s1] sm:$0xf]  ;;  %v1669_v1 = vmov 0   ;;  %v1670_v2 = vmov 2   ;;  %s2059_s10 = smov (!%p134_p3, %s1569_s10), 1  ;;  %v1671_v4 = vmov 12  }
   0xc   : > { %1609 = vset.pattern.permute.xlu1 %v1669_v1  ;;  %1611 = vset.pattern.permute.xlu2 %v1670_v2  ;;  %s1580_s13 = sshll.u32 %s2059_s10, 3  ;;  %v1672_v5 = vmov 1   ;;  %v1673_v6 = vmov 3   ;;  %vm158_vm0 = vcmask 1043456   ;;  %v1728_v12 = vld [vmem:[%s2056_s1] sm:$0xff]  ;;  %v1733_v13 = vld [vmem:[%s2056_s1 + $0x8] sm:$0xff] }
   0xd   : > { %207 = vperm.xlu1 %1609, %v145_v0   ;;  %220 = vperm.xlu2 %1611, %v145_v0   ;;  %s138_s16 = scalar_lea.vmem %s2055_s0, %s1580_s13  ;;  %v1674_v14 = vmov 4   ;;  %v1675_v15 = vmov 5   ;;  %v1676_v16 = vmov 6   ;;  %v1677_v17 = vmov 7   ;;  %s1581_s6 = sshll.u32 %s2059_s10, 5 }
   0xe   : > { %v1720_v3 = vld [vmem:[%s138_s16] sm:$0xff]  ;;  %1613 = vset.pattern.permute.xlu0 %v1671_v4  ;;  %v1678_v18 = vmov 8   ;;  %v1679_v19 = vmov 10   ;;  %v1680_v20 = vmov 13   ;;  %v1681_v26 = vmov 9   ;;  %s2042_s11 = scalar_lea.vmem %s2057_s2, %s1581_s6 }
   0xf   : > { %153 = vst [vmem:[#allocation1] ss:$2 sm:$0xff] %v1720_v3  ;;  %v210_v38 = vperm.slane %v1720_v3, 0  ;;  %v216_v39 = vperm.slane %v1720_v3, 1  ;;  %v223_v43 = vperm.slane %v1720_v3, 2  ;;  %v230_v47 = vperm.slane %v1720_v3, 3 }
  0x10   : > { %v1682_v62 = vmov 11   ;;  %vm409_vm4 = vcmask 523264   ;;  %vm565_vm6 = vcmask 130048  }
  0x15   : > { %1610 = vset.pattern.permute.xlu1 %v1672_v5  ;;  %1612 = vset.pattern.permute.xlu2 %v1673_v6  ;;  %v1683_v6 = vmov 14  }
  0x16   : > { %213 = vperm.xlu1 %1610, %v145_v0   ;;  %227 = vperm.xlu2 %1612, %v145_v0   ;;  %v154_v7 = vld.sshfl [vmem:[#allocation1] sm:$0xff pattern:$0x75316420]  ;;  %v155_v8 = vld.sshfl [vmem:[#allocation1 + $0x8] sm:$0xff pattern:$0x75316420] }
  0x17   : > { %v159_v9 = vsel %vm158_vm0, %v154_v7, 0.0  ;;  %v160_v10 = vsel %vm158_vm0, %v155_v8, 0.0 }
  0x18   : > { %v161_v11 = vadd.f32 %v160_v10, %v159_v9 }
  0x1a   : > { %162 = vadd.xlane.f32.xlu0 %v161_v11 }
  0x1e   : > { %1614 = vset.pattern.permute.xlu1 %v1674_v14  ;;  %1615 = vset.pattern.permute.xlu2 %v1674_v14 }
  0x1f   : > { %240 = vperm.xlu1 %1614, %v1728_v12   ;;  %245 = vperm.xlu2 %1615, %v1733_v13  }
  0x27   : > { %1616 = vset.pattern.permute.xlu1 %v1675_v15  ;;  %1617 = vset.pattern.permute.xlu2 %v1675_v15 }
  0x28   : > { %252 = vperm.xlu1 %1616, %v1728_v12   ;;  %256 = vperm.xlu2 %1617, %v1733_v13  }
  0x2e   : > { %234 = vperm.xlu0 %1613, %v145_v0  }
  0x30   : > { %1618 = vset.pattern.permute.xlu1 %v1676_v16  ;;  %1619 = vset.pattern.permute.xlu2 %v1676_v16 }
  0x31   : > { %265 = vperm.xlu1 %1618, %v1728_v12   ;;  %269 = vperm.xlu2 %1619, %v1733_v13  }
  0x36   : > { %1624 = vset.pattern.permute.xlu0 %v1681_v26 }
  0x39   : > { %1620 = vset.pattern.permute.xlu1 %v1677_v17  ;;  %1621 = vset.pattern.permute.xlu2 %v1677_v17 }
  0x3a   : > { %278 = vperm.xlu1 %1620, %v1728_v12   ;;  %282 = vperm.xlu2 %1621, %v1733_v13  }
  0x42   : > { %1623 = vset.pattern.permute.xlu2 %v1678_v18  ;;  %1622 = vset.pattern.permute.xlu1 %v1678_v18 }
  0x43   : > { %305 = vperm.xlu2 %1623, %v1733_v13   ;;  %301 = vperm.xlu1 %1622, %v1728_v12  }
  0x4b   : > { %1626 = vset.pattern.permute.xlu2 %v1679_v19  ;;  %1625 = vset.pattern.permute.xlu1 %v1681_v26 }
  0x4c   : > { %342 = vperm.xlu2 %1626, %v1728_v12   ;;  %324 = vperm.xlu1 %1625, %v1733_v13  }
  0x54   : > { %1628 = vset.pattern.permute.xlu2 %v1680_v20  ;;  %1627 = vset.pattern.permute.xlu1 %v1679_v19 }
  0x55   : > { %291 = vperm.xlu2 %1628, %v1728_v12   ;;  %346 = vperm.xlu1 %1627, %v1733_v13  }
  0x5d   : > { %1630 = vset.pattern.permute.xlu1 %v1682_v62  ;;  %1631 = vset.pattern.permute.xlu2 %v1682_v62 }
  0x5e   : > { %364 = vperm.xlu1 %1630, %v1728_v12   ;;  %368 = vperm.xlu2 %1631, %v1733_v13  }
  0x66   : > { %1632 = vset.pattern.permute.xlu1 %v1683_v6  ;;  %1633 = vset.pattern.permute.xlu2 %v1683_v6 }
  0x67   : > { %v221_v21 = vpop.permute.xlu2 %220  ;;  %386 = vperm.xlu1 %1632, %v1728_v12   ;;  %390 = vperm.xlu2 %1633, %v1733_v13  }
  0x68   : > { %v224_v46 = vmul.f32 %v223_v43, %v221_v21 }
  0x70   : > { %v228_v22 = vpop.permute.xlu2 %227 }
  0x71   : > { %v231_v52 = vmul.f32 %v230_v47, %v228_v22 }
  0x79   : > { %v1748_v23 = vpop.permute.xlu2 %245 }
  0x7f   : > { %v208_v24 = vpop.permute.xlu1 %207 }
  0x80   : > { %v211_v44 = vmul.f32 %v210_v38, %v208_v24 }
  0x82   : > { %v1752_v31 = vpop.permute.xlu2 %256 }
  0x88   : > { %v214_v33 = vpop.permute.xlu1 %213 }
  0x89   : > { %v217_v45 = vmul.f32 %v216_v39, %v214_v33 }
  0x8b   : > { %v270_v40 = vpop.permute.xlu2 %269  ;;  %v218_v48 = vadd.f32 %v217_v45, %v211_v44 }
  0x8d   : > { %v163_v25 = vpop.xlane.xlu0 %162  ;;  %v225_v55 = vadd.f32 %v224_v46, %v218_v48 }
  0x8e   : > { %v164_v27 = vsel %vm158_vm0, %v163_v25, 0.0 }
  0x8f   : > { %v165_v28 = vrot.slane %v164_v27, 4  ;;  %v232_v58 = vadd.f32 %v231_v52, %v225_v55 }
  0x91   : > { %v166_v29 = vadd.f32 %v165_v28, %v164_v27  ;;  %v241_v42 = vpop.permute.xlu1 %240 }
  0x93   : > { %v167_v30 = vrot.slane %v166_v29, 2 }
  0x94   : > { %v283_v51 = vpop.permute.xlu2 %282 }
  0x95   : > { %v168_v32 = vadd.f32 %v167_v30, %v166_v29 }
  0x97   : > { %v169_v34 = vrot.slane %v168_v32, 1 }
  0x99   : > { %v170_v35 = vadd.f32 %v169_v34, %v168_v32 }
  0x9a   : > { %v253_v57 = vpop.permute.xlu1 %252 }
  0x9b   : > { %v171_v36 = vmul.f32 0.0009765625, %v170_v35 }
  0x9d   : > { %v1756_v37 = vsub.f32 %v1720_v3, %v171_v36  ;;  %v1767_v61 = vpop.permute.xlu2 %305 }
  0x9f   : > { %v173_v41 = vmul.f32 %v1756_v37, %v1756_v37 }
  0xa0   : > { %v235_v59 = vpop.permute.xlu0 %234 }
  0xa1   : > { %175 = vst [vmem:[#allocation1] ss:$2 sm:$0xff] %v173_v41  ;;  %v237_v60 = vadd.f32 %v235_v59, %v232_v58 }
  0xa3   : > { %v266_v63 = vpop.permute.xlu1 %265  ;;  %v248_v0 = vperm.slane %v237_v60, 0  ;;  %v259_v1 = vperm.slane %v237_v60, 1  ;;  %v272_v5 = vperm.slane %v237_v60, 2  ;;  %v285_v8 = vperm.slane %v237_v60, 3 }
  0xa5   : > { %v249_v2 = vmul.f32 %v248_v0, %v241_v42  ;;  %v260_v4 = vmul.f32 %v259_v1, %v253_v57  ;;  %v273_v10 = vmul.f32 %v272_v5, %v266_v63  ;;  %v250_v21 = vmul.f32 %v248_v0, %v1748_v23 }
  0xa6   : > { %v1771_v7 = vpop.permute.xlu2 %342  ;;  %v261_v22 = vmul.f32 %v259_v1, %v1752_v31  ;;  %v274_v25 = vmul.f32 %v272_v5, %v270_v40  ;;  %v287_v27 = vmul.f32 %v285_v8, %v283_v51 }
  0xa7   : > { %v262_v9 = vadd.f32 %v260_v4, %v249_v2 }
  0xa8   : > { %v176_v49 = vld.sshfl [vmem:[#allocation1] sm:$0xff pattern:$0x75316420]  ;;  %v177_v50 = vld.sshfl [vmem:[#allocation1 + $0x8] sm:$0xff pattern:$0x75316420]  ;;  %v263_v24 = vadd.f32 %v261_v22, %v250_v21 }
  0xa9   : > { %v180_v53 = vsel %vm158_vm0, %v176_v49, 0.0  ;;  %v181_v54 = vsel %vm158_vm0, %v177_v50, 0.0  ;;  %476 = vst [vmem:[#allocation1] ss:$2 sm:$0xff] %v1720_v3  ;;  %v275_v15 = vadd.f32 %v273_v10, %v262_v9 }
  0xaa   : > { %v182_v56 = vadd.f32 %v181_v54, %v180_v53  ;;  %v276_v26 = vadd.f32 %v274_v25, %v263_v24 }
  0xac   : > { %183 = vadd.xlane.f32.xlu0 %v182_v56  ;;  %v279_v11 = vpop.permute.xlu1 %278  ;;  %v289_v28 = vadd.f32 %v287_v27, %v276_v26 }
  0xad   : > { %v286_v14 = vmul.f32 %v285_v8, %v279_v11 }
  0xaf   : > { %v288_v16 = vadd.f32 %v286_v14, %v275_v15  ;;  %v292_v17 = vpop.permute.xlu2 %291 }
  0xb1   : > { %v1778_v18 = vadd.f32 %v292_v17, %v288_v16 }
  0xb3   : > { %v398_v19 = vrot.slane %v1778_v18, 5 }
  0xb5   : > { %v302_v35 = vpop.permute.xlu1 %301 }
  0xb8   : > { %v369_v62 = vpop.permute.xlu2 %368 }
  0xbe   : > { %v325_v31 = vpop.permute.xlu1 %324 }
  0xc0   : > { %320 = vperm.xlu0 %1624, %v1728_v12  }
  0xc7   : > { %v347_v47 = vpop.permute.xlu1 %346 }
  0xc8   : > { %1629 = vset.pattern.permute.xlu0 %v1680_v20 }
  0xc9   : > { %295 = vperm.xlu0 %1629, %v1733_v13  }
  0xd0   : > { %v365_v60 = vpop.permute.xlu1 %364 }
  0xd1   : > { %399 = vrot.lane.b32.xlu0 %v398_v19, %s1684_s21 }
 0x11f   : > { %v184_v29 = vpop.xlane.xlu0 %183 }
 0x120   : > { %v185_v20 = vsel %vm158_vm0, %v184_v29, 0.0 }
 0x121   : > { %v186_v30 = vrot.slane %v185_v20, 4 }
 0x123   : > { %v187_v32 = vadd.f32 %v186_v30, %v185_v20 }
 0x125   : > { %v188_v33 = vrot.slane %v187_v32, 2 }
 0x127   : > { %v189_v34 = vadd.f32 %v188_v33, %v187_v32 }
 0x129   : > { %v190_v36 = vrot.slane %v189_v34, 1 }
 0x12b   : > { %v191_v38 = vadd.f32 %v190_v36, %v189_v34 }
 0x12d   : > { %v192_v39 = vmul.f32 0.0009765625, %v191_v38 }
 0x12f   : > { %v193_v41 = vadd.f32 1e-05, %v192_v39 }
 0x131   : > { %1639 = vrsqrt.f32 %v193_v41  ;;  %vm200_vm2 = vweird.f32 %v193_v41 }
 0x132   : > { %v321_v23 = vpop.permute.xlu0 %320 }
 0x137   : > { %v1640_v42 = vpop.eup %1639 }
 0x138   : > { %v195_v40 = vmul.f32 %v1640_v42, %v193_v41  ;;  %vm201_vm1 = vweird.f32 %v1640_v42 }
 0x139   : > { %vm202_vm3 = vmor %vm200_vm2, %vm201_vm1 }
 0x13a   : > { %v196_v43 = vmul.f32 %v1640_v42, %v195_v40 }
 0x13b   : > { %v296_v44 = vpop.permute.xlu0 %295 }
 0x13c   : > { %v197_v45 = vmul.f32 0.5, %v196_v43  ;;  %v1785_v46 = vadd.f32 %v296_v44, %v289_v28 }
 0x13e   : > { %v198_v48 = vsub.f32 1.5, %v197_v45  ;;  %v418_v49 = vrot.slane %v1785_v46, 3  ;;  %v405_v50 = vrot.slane %v1785_v46, 7 }
 0x140   : > { %v199_v51 = vmul.f32 %v1640_v42, %v198_v48  ;;  %419 = vrot.lane.b32.xlu2 %v418_v49, %s1684_s21  ;;  %406 = vrot.lane.b32.xlu1 %v405_v50, %s1684_s21  ;;  %v1805_v48 = vld.sshfl [vmem:[#allocation1] sm:$0xff pattern:$0x75316420]  ;;  %v478_v49 = vld.sshfl [vmem:[#allocation1 + $0x8] sm:$0xff pattern:$0x75316420] }
 0x141   : > { %482 = vst [vmem:[#allocation1 + $0x1] ss:$2 sm:$0xff] %v1720_v3 }
 0x142   : > { %v203_v52 = vsel %vm202_vm3, %v1640_v42, %v199_v51 }
 0x143   : > { %v204_v53 = vmul.f32 %v203_v52, %v1756_v37 }
 0x145   : > { %v309_v54 = vperm.slane %v204_v53, 0  ;;  %v310_v55 = vperm.slane %v204_v53, 4  ;;  %v327_v56 = vperm.slane %v204_v53, 1  ;;  %v328_v57 = vperm.slane %v204_v53, 5 }
 0x146   : > { %v349_v58 = vperm.slane %v204_v53, 2  ;;  %v350_v59 = vperm.slane %v204_v53, 6  ;;  %v371_v6 = vperm.slane %v204_v53, 3  ;;  %v372_v26 = vperm.slane %v204_v53, 7 }
 0x147   : > { %v313_v63 = vperm.slane %v309_v54, 0  ;;  %v314_v0 = vperm.slane %v310_v55, 0  ;;  %v331_v1 = vperm.slane %v327_v56, 1  ;;  %v332_v2 = vperm.slane %v328_v57, 1  ;;  %v400_v55 = vpop.permute.xlu0 %399 }
 0x148   : > { %v353_v4 = vperm.slane %v349_v58, 2  ;;  %v354_v5 = vperm.slane %v350_v59, 2  ;;  %v375_v27 = vperm.slane %v371_v6, 3  ;;  %v376_v30 = vperm.slane %v372_v26, 3 }
 0x149   : > { %v315_v8 = vmul.f32 %v313_v63, %v302_v35  ;;  %v316_v9 = vmul.f32 %v314_v0, %v302_v35  ;;  %v333_v10 = vmul.f32 %v331_v1, %v321_v23  ;;  %v334_v11 = vmul.f32 %v332_v2, %v321_v23  ;;  %v387_v35 = vpop.permute.xlu1 %386  ;;  %v483_v50 = vld.sshfl [vmem:[#allocation1] sm:$0xff pattern:$0x75316420]  ;;  %v484_v51 = vld.sshfl [vmem:[#allocation1 + $0x8] sm:$0xff pattern:$0x75316420] }
 0x14a   : > { %v317_v37 = vmul.f32 %v313_v63, %v1767_v61  ;;  %v318_v14 = vmul.f32 %v314_v0, %v1767_v61  ;;  %v335_v15 = vmul.f32 %v331_v1, %v325_v31  ;;  %v336_v16 = vmul.f32 %v332_v2, %v325_v31  ;;  %v391_v61 = vpop.permute.xlu2 %390  ;;  %487 = vst [vmem:[#allocation1] ss:$2 sm:$0xff] %v1720_v3 }
 0x14b   : > { %v337_v17 = vadd.f32 %v333_v10, %v315_v8  ;;  %v338_v19 = vadd.f32 %v334_v11, %v316_v9  ;;  %v355_v21 = vmul.f32 %v353_v4, %v1771_v7  ;;  %v357_v24 = vmul.f32 %v353_v4, %v347_v47 }
 0x14c   : > { %v339_v22 = vadd.f32 %v335_v15, %v317_v37  ;;  %v356_v25 = vmul.f32 %v354_v5, %v1771_v7  ;;  %v340_v29 = vadd.f32 %v336_v16, %v318_v14  ;;  %v377_v32 = vmul.f32 %v375_v27, %v365_v60 }
 0x14d   : > { %v359_v28 = vadd.f32 %v355_v21, %v337_v17  ;;  %v379_v33 = vmul.f32 %v375_v27, %v369_v62  ;;  %v358_v36 = vmul.f32 %v354_v5, %v347_v47  ;;  %v378_v38 = vmul.f32 %v376_v30, %v365_v60 }
 0x14e   : > { %v361_v20 = vadd.f32 %v357_v24, %v339_v22  ;;  %v360_v34 = vadd.f32 %v356_v25, %v338_v19  ;;  %v380_v40 = vmul.f32 %v376_v30, %v369_v62  ;;  %v461_v47 = vrot.slane %v1778_v18, 1 }
 0x14f   : > { %v381_v41 = vadd.f32 %v377_v32, %v359_v28  ;;  %v362_v23 = vadd.f32 %v358_v36, %v340_v29  ;;  %v431_v54 = vlaneseq  ;;  %v403_v58 = vrot.slane %v1785_v46, 2 }
 0x150   : > { %v383_v39 = vadd.f32 %v379_v33, %v361_v20  ;;  %v382_v42 = vadd.f32 %v378_v38, %v360_v34  ;;  %v448_v63 = vrot.slane %v1785_v46, 6  ;;  %v410_v1 = vsel %vm409_vm4, %v1778_v18, %v400_v55 }
 0x151   : > { %v393_v7 = vadd.f32 %v387_v35, %v381_v41  ;;  %v384_v44 = vadd.f32 %v380_v40, %v362_v23  ;;  %v1809_v52 = vld.sshfl [vmem:[#allocation1] sm:$0xff pattern:$0x75316420]  ;;  %v1811_v53 = vld.sshfl [vmem:[#allocation1 + $0x8] sm:$0xff pattern:$0x75316420] }
 0x152   : > { %v1796_v31 = vadd.f32 %v391_v61, %v383_v39  ;;  %v394_v43 = vadd.f32 %v387_v35, %v382_v42  ;;  %493 = vst [vmem:[#allocation1 + $0x1] ss:$2 sm:$0xff] %v1720_v3  ;;  %v432_v59 = vand.u32 127, %v431_v54  ;;  %v438_v11 = vperm.slane %v410_v1, 1 }
 0x153   : > { %423 = vrot.lane.b32.xlu0 %v393_v7, %s1684_s21  ;;  %v396_v45 = vadd.f32 %v391_v61, %v384_v44  ;;  %v412_v46 = vperm.slane %v410_v1, 0  ;;  %v451_v21 = vperm.slane %v410_v1, 2  ;;  %v499_v42 = vsel %vm158_vm0, %v478_v49, %v484_v51 }
 0x154   : > { %425 = vrot.lane.b32.xlu1 %v1796_v31, %s1684_s21  ;;  %427 = vrot.lane.b32.xlu2 %v394_v43, %s1684_s21  ;;  %vm433_vm5 = vcmp.lt.s32.totalorder %v432_v59, 64 }
 0x155   : > { %v414_v17 = vmul.f32 %v412_v46, %v393_v7  ;;  %v416_v22 = vmul.f32 %v412_v46, %v1796_v31  ;;  %v455_v61 = vmul.f32 %v451_v21, %v396_v45  ;;  %v453_v35 = vmul.f32 %v451_v21, %v394_v43 }
 0x159   : > { %v495_v40 = vld.sshfl [vmem:[#allocation1 + $0x8] sm:$0xff pattern:$0x75316420] }
 0x15b   : > { %429 = vrot.lane.b32.xlu0 %v396_v45, %s1684_s21 }
 0x15c   : > { %462 = vrot.lane.b32.xlu1 %v461_v47, %s1684_s21 }
 0x19a   : > { %v420_v56 = vpop.permute.xlu2 %419 }
 0x19b   : > { %v422_v62 = vsel %vm409_vm4, %v403_v58, %v420_v56  ;;  %v450_v2 = vsel %vm409_vm4, %v448_v63, %v420_v56 }
 0x19c   : > { %v439_v3 = vperm.slane %v422_v62, 1  ;;  %v452_v37 = vperm.slane %v450_v2, 2  ;;  %v467_v24 = vperm.slane %v450_v2, 3 }
 0x19e   : > { %v454_v19 = vmul.f32 %v452_v37, %v393_v7  ;;  %v456_v39 = vmul.f32 %v452_v37, %v1796_v31  ;;  %v494_v7 = vld.sshfl [vmem:[#allocation1] sm:$0xff pattern:$0x75316420] }
 0x19f   : > { %v500_v31 = vsel %vm158_vm0, %v1809_v52, %v494_v7 }
 0x1ae   : > { %v428_v4 = vpop.permute.xlu2 %427 }
 0x1b2   : > { %v407_v57 = vpop.permute.xlu1 %406 }
 0x1b3   : > { %v411_v60 = vsel %vm409_vm4, %v403_v58, %v407_v57  ;;  %v501_v58 = vsel %vm158_vm0, %v1811_v53, %v495_v40 }
 0x1b4   : > { %v413_v0 = vperm.slane %v411_v60, 0 }
 0x1b6   : > { %v415_v14 = vmul.f32 %v413_v0, %v394_v43  ;;  %v417_v30 = vmul.f32 %v413_v0, %v396_v45 }
 0x1c5   : > { %v424_v5 = vpop.permute.xlu0 %423 }
 0x1c6   : > { %v426_v6 = vpop.permute.xlu1 %425  ;;  %v436_v8 = vsel %vm433_vm5, %v428_v4, %v424_v5  ;;  %v434_v9 = vsel %vm433_vm5, %v424_v5, %v428_v4 }
 0x1c7   : > { %v441_v10 = vmul.f32 %v439_v3, %v436_v8  ;;  %v440_v15 = vmul.f32 %v438_v11, %v434_v9  ;;  %v469_v36 = vmul.f32 %v467_v24, %v434_v9 }
 0x1c9   : > { %v445_v16 = vadd.f32 %v441_v10, %v415_v14  ;;  %v444_v26 = vadd.f32 %v440_v15, %v414_v17 }
 0x1cb   : > { %v458_v27 = vadd.f32 %v454_v19, %v445_v16  ;;  %v457_v44 = vadd.f32 %v453_v35, %v444_v26 }
 0x1cd   : > { %v430_v25 = vpop.permute.xlu0 %429  ;;  %v473_v47 = vadd.f32 %v469_v36, %v458_v27 }
 0x1ce   : > { %v463_v28 = vpop.permute.xlu1 %462  ;;  %v435_v29 = vsel %vm433_vm5, %v426_v6, %v430_v25  ;;  %v437_v20 = vsel %vm433_vm5, %v430_v25, %v426_v6 }
 0x1cf   : > { %v465_v32 = vsel %vm409_vm4, %v1778_v18, %v463_v28  ;;  %v442_v33 = vmul.f32 %v438_v11, %v435_v29  ;;  %v443_v34 = vmul.f32 %v439_v3, %v437_v20  ;;  %v498_v18 = vsel %vm158_vm0, %v1805_v48, %v483_v50 }
 0x1d0   : > { %v466_v38 = vperm.slane %v465_v32, 3  ;;  %v471_v43 = vmul.f32 %v467_v24, %v435_v29  ;;  %v1838_v60 = vadd.f32 %v499_v42, %v473_v47 }
 0x1d1   : > { %v446_v41 = vadd.f32 %v442_v33, %v416_v22  ;;  %v447_v23 = vadd.f32 %v443_v34, %v417_v30  ;;  %v148_v33 = vld [vmem:[%s2056_s1 + $0x10] sm:$0xff] }
 0x1d2   : > { %v468_v54 = vmul.f32 %v466_v38, %v436_v8  ;;  %v470_v45 = vmul.f32 %v466_v38, %v437_v20  ;;  %v567_v34 = vsel %vm565_vm6, %v148_v33, 0  ;;  %v149_v38 = vld [vmem:[%s2056_s1 + $0x18] sm:$0xff] }
 0x1d3   : > { %v459_v55 = vadd.f32 %v455_v61, %v446_v41  ;;  %v460_v56 = vadd.f32 %v456_v39, %v447_v23  ;;  %v1856_v61 = vand.u32 4294901760, %v567_v34  ;;  %v1685_v23 = vmov 15  }
 0x1d4   : > { %v472_v57 = vadd.f32 %v468_v54, %v457_v44  ;;  %1635 = vset.pattern.permute.xlu0 %v1685_v23  ;;  %1634 = vset.pattern.permute.xlu2 %v1685_v23  ;;  %v570_v42 = vsel %vm565_vm6, %v149_v38, 0 }
 0x1d5   : > { %v474_v49 = vadd.f32 %v470_v45, %v459_v55  ;;  %v475_v51 = vadd.f32 %v471_v43, %v460_v56  ;;  %v1862_v41 = vsub.f32 %v567_v34, %v1856_v61  ;;  %v1870_v47 = vand.u32 4294901760, %v570_v42 }
 0x1d6   : > { %v1836_v59 = vadd.f32 %v498_v18, %v472_v57 }
 0x1d7   : > { %v1840_v62 = vadd.f32 %v500_v31, %v474_v49  ;;  %v1842_v48 = vadd.f32 %v501_v58, %v475_v51  ;;  %v1868_v44 = vand.u32 4294901760, %v1862_v41  ;;  %v1875_v56 = vsub.f32 %v570_v42, %v1870_v47 }
 0x1d8   : > { %v506_v50 = vadd.f32 %v1838_v60, %v1836_v59 }
 0x1d9   : > { %v509_v63 = vadd.f32 %v1842_v48, %v1840_v62  ;;  %v593_v55 = vsub.f32 %v1862_v41, %v1868_v44 }
 0x1da   : > { %507 = vadd.xlane.f32.xlu2 %v506_v50  ;;  %v1878_v50 = vand.u32 4294901760, %v1875_v56 }
 0x1db   : > { %510 = vadd.xlane.f32.xlu0 %v509_v63  ;;  %v594_v51 = vand.u32 4294901760, %v593_v55 }
 0x1ef   : > { %558 = vperm.xlu0 %1635, %v1728_v12  }
 0x24d   : > { %v508_v52 = vpop.xlane.xlu2 %507 }
 0x24e   : > { %v511_v53 = vpop.xlane.xlu0 %510 }
 0x24f   : > { %v512_v0 = vadd.f32 %v511_v53, %v508_v52 }
 0x251   : > { %v513_v1 = vrot.slane %v512_v0, 4 }
 0x253   : > { %v514_v3 = vadd.f32 %v513_v1, %v512_v0 }
 0x255   : > { %v515_v2 = vrot.slane %v514_v3, 2 }
 0x257   : > { %v516_v4 = vadd.f32 %v515_v2, %v514_v3 }
 0x259   : > { %v517_v5 = vrot.slane %v516_v4, 1 }
 0x25b   : > { %v518_v6 = vadd.f32 %v517_v5, %v516_v4  ;;  %v601_v5 = vsub.f32 %v1875_v56, %v1878_v50 }
 0x25d   : > { %v519_v8 = vmul.f32 0.00024414063, %v518_v6 }
 0x25f   : > { %v522_v9 = vsub.f32 %v1840_v62, %v519_v8  ;;  %v523_v10 = vsub.f32 %v1842_v48, %v519_v8  ;;  %v520_v11 = vsub.f32 %v1836_v59, %v519_v8  ;;  %v521_v37 = vsub.f32 %v1838_v60, %v519_v8 }
 0x261   : > { %v526_v14 = vmul.f32 %v522_v9, %v522_v9  ;;  %v527_v46 = vmul.f32 %v523_v10, %v523_v10  ;;  %v524_v15 = vmul.f32 %v520_v11, %v520_v11  ;;  %v525_v16 = vmul.f32 %v521_v37, %v521_v37 }
 0x263   : > { %v531_v17 = vadd.f32 %v527_v46, %v526_v14  ;;  %v528_v19 = vadd.f32 %v525_v16, %v524_v15  ;;  %v602_v46 = vand.u32 4294901760, %v601_v5 }
 0x265   : > { %532 = vadd.xlane.f32.xlu2 %v531_v17  ;;  %529 = vadd.xlane.f32.xlu1 %v528_v19  ;;  %v559_v17 = vpop.permute.xlu0 %558 }
 0x27d   : > { %562 = vperm.xlu2 %1634, %v1733_v13  }
 0x2d8   : > { %v533_v21 = vpop.xlane.xlu2 %532  ;;  %v530_v22 = vpop.xlane.xlu1 %529 }
 0x2d9   : > { %v534_v24 = vadd.f32 %v533_v21, %v530_v22 }
 0x2db   : > { %v535_v25 = vrot.slane %v534_v24, 4 }
 0x2dd   : > { %v536_v26 = vadd.f32 %v535_v25, %v534_v24 }
 0x2df   : > { %v537_v27 = vrot.slane %v536_v26, 2 }
 0x2e1   : > { %v538_v28 = vadd.f32 %v537_v27, %v536_v26  ;;  %v563_v27 = vpop.permute.xlu2 %562 }
 0x2e3   : > { %v539_v29 = vrot.slane %v538_v28, 1 }
 0x2e5   : > { %v540_v20 = vadd.f32 %v539_v29, %v538_v28 }
 0x2e7   : > { %v541_v30 = vmul.f32 0.00024414063, %v540_v20 }
 0x2e9   : > { %v542_v32 = vadd.f32 1e-05, %v541_v30 }
 0x2eb   : > { %1641 = vrsqrt.f32 %v542_v32  ;;  %vm549_vm8 = vweird.f32 %v542_v32 }
 0x2f1   : > { %v1642_v35 = vpop.eup %1641 }
 0x2f2   : > { %v544_v36 = vmul.f32 %v1642_v35, %v542_v32  ;;  %vm550_vm7 = vweird.f32 %v1642_v35 }
 0x2f3   : > { %vm551_vm9 = vmor %vm549_vm8, %vm550_vm7 }
 0x2f4   : > { %v545_v39 = vmul.f32 %v1642_v35, %v544_v36 }
 0x2f6   : > { %v546_v7 = vmul.f32 0.5, %v545_v39 }
 0x2f8   : > { %v547_v40 = vsub.f32 1.5, %v546_v7 }
 0x2fa   : > { %v548_v54 = vmul.f32 %v1642_v35, %v547_v40 }
 0x2fc   : > { %v552_v18 = vsel %vm551_vm9, %v1642_v35, %v548_v54 }
 0x2fd   : > { %v555_v12 = vmul.f32 %v552_v18, %v522_v9  ;;  %v553_v13 = vmul.f32 %v552_v18, %v520_v11  ;;  %v556_v45 = vmul.f32 %v552_v18, %v523_v10  ;;  %v554_v43 = vmul.f32 %v552_v18, %v521_v37 }
 0x2ff   : > { %v586_v57 = vand.u32 4294901760, %v555_v12  ;;  %v588_v31 = vand.u32 4294901760, %v553_v13  ;;  %v776_v58 = vand.u32 4294901760, %v556_v45  ;;  %v778_v49 = vand.u32 4294901760, %v554_v43 }
 0x301   : > { %587 = vmatpush.msra.mxu0 %v586_v57  ;;  %688 = vmatpush.msra.mxu3 %v586_v57  ;;  %v622_v63 = vsub.f32 %v555_v12, %v586_v57  ;;  %v628_v52 = vsub.f32 %v553_v13, %v588_v31  ;;  %v812_v53 = vsub.f32 %v556_v45, %v776_v58 }
 0x302   : > { %v818_v0 = vsub.f32 %v554_v43, %v778_v49 }
 0x303   : > { %589 = vmatpush.msra.mxu0 %v588_v31  ;;  %658 = vmatpush.msra.mxu2 %v622_v63  ;;  %v623_v1 = vand.u32 4294901760, %v622_v63  ;;  %v629_v3 = vand.u32 4294901760, %v628_v52  ;;  %v813_v2 = vand.u32 4294901760, %v812_v53 }
 0x304   : > { %690 = vmatpush.msra.mxu3 %v588_v31  ;;  %595 = vmatmul.f32.vlgmr.msra.gmra.mxu0 %v594_v51  ;;  %v819_v4 = vand.u32 4294901760, %v818_v0 }
 0x305   : > { %661 = vmatpush.msra.mxu2 %v628_v52  ;;  %721 = vmatpush.msrb.mxu0 %v623_v1  ;;  %v624_v6 = vsub.f32 %v622_v63, %v623_v1  ;;  %v814_v8 = vsub.f32 %v812_v53, %v813_v2  ;;  %v630_v9 = vsub.f32 %v628_v52, %v629_v3 }
 0x306   : > { %664 = vmatmul.f32.vlgmr.msra.gmra.mxu2 %v1862_v41  ;;  %694 = vmatmul.f32.vlgmr.msra.gmra.mxu3 %v1868_v44  ;;  %v820_v10 = vsub.f32 %v818_v0, %v819_v4 }
 0x307   : > { %777 = vmatpush.msrb.mxu2 %v776_v58  ;;  %725 = vmatpush.msrb.mxu0 %v629_v3  ;;  %v625_v11 = vand.u32 4294901760, %v624_v6  ;;  %v815_v37 = vand.u32 4294901760, %v814_v8  ;;  %v631_v14 = vand.u32 4294901760, %v630_v9 }
 0x308   : > { %v821_v15 = vand.u32 4294901760, %v820_v10 }
 0x309   : > { %848 = vmatpush.msra.mxu0 %v812_v53  ;;  %779 = vmatpush.msrb.mxu2 %v778_v49 }
 0x30a   : > { %626 = vmatpush.msra.mxu1 %v625_v11  ;;  %816 = vmatpush.msrb.mxu3 %v815_v37 }
 0x30b   : > { %911 = vmatpush.msra.mxu2 %v813_v2  ;;  %851 = vmatpush.msra.mxu0 %v818_v0 }
 0x30c   : > { %632 = vmatpush.msra.mxu1 %v631_v14  ;;  %822 = vmatpush.msrb.mxu3 %v821_v15 }
 0x30d   : > { %915 = vmatpush.msra.mxu2 %v819_v4  ;;  %603 = vmatmul.f32.gmra.mxu0 %v602_v46 }
 0x30e   : > { %634 = vmatmul.f32.vlgmr.msra.gmra.mxu1 %v1856_v61  ;;  %940 = vmatpush.msra.mxu3 %v776_v58 }
 0x30f   : > { %750 = vmatpush.msrb.mxu1 %v586_v57  ;;  %669 = vmatmul.f32.gmra.mxu2 %v1875_v56 }
 0x310   : > { %700 = vmatmul.f32.gmra.mxu3 %v1878_v50 }
 0x311   : > { %752 = vmatpush.msrb.mxu1 %v588_v31  ;;  %942 = vmatpush.msra.mxu3 %v778_v49 }
 0x313   : > { %878 = vmatpush.msra.mxu1 %v776_v58 }
 0x315   : > { %880 = vmatpush.msra.mxu1 %v778_v49  ;;  %727 = vmatmul.f32.vlgmr.msrb.gmra.mxu0 %v1856_v61 }
 0x316   : > { %638 = vmatmul.f32.gmra.mxu1 %v1870_v47 }
 0x317   : > { %785 = vmatmul.f32.vlgmr.msrb.gmra.mxu2 %v594_v51 }
 0x318   : > { %824 = vmatmul.f32.vlgmr.msrb.gmra.mxu3 %v1856_v61 }
 0x31d   : > { %731 = vmatmul.f32.gmra.mxu0 %v1870_v47 }
 0x31e   : > { %754 = vmatmul.f32.vlgmr.msrb.gmra.mxu1 %v1856_v61 }
 0x31f   : > { %793 = vmatmul.f32.gmra.mxu2 %v602_v46 }
 0x320   : > { %828 = vmatmul.f32.gmra.mxu3 %v1870_v47 }
 0x325   : > { %854 = vmatmul.f32.vlgmr.msra.gmra.mxu0 %v1862_v41 }
 0x326   : > { %758 = vmatmul.f32.gmra.mxu1 %v1870_v47 }
 0x327   : > { %917 = vmatmul.f32.vlgmr.msra.gmra.mxu2 %v1856_v61 }
 0x328   : > { %944 = vmatmul.f32.vlgmr.msra.gmra.mxu3 %v1856_v61 }
 0x32d   : > { %859 = vmatmul.f32.gmra.mxu0 %v1875_v56 }
 0x32e   : > { %884 = vmatmul.f32.vlgmr.msra.gmra.mxu1 %v1868_v44 }
 0x32f   : > { %921 = vmatmul.f32.gmra.mxu2 %v1870_v47 }
 0x330   : > { %948 = vmatmul.f32.gmra.mxu3 %v1870_v47 }
 0x336   : > { %890 = vmatmul.f32.gmra.mxu1 %v1878_v50 }
 0x381   : > { %v596_v16 = vpop.f32.mrf.mxu0 }
 0x382   : > { %v597_v25 = vadd.f32 %v596_v16, %v559_v17 }
 0x389   : > { %v665_v19 = vpop.f32.mrf.mxu2  ;;  %v695_v21 = vpop.f32.mrf.mxu3 }
 0x38a   : > { %v604_v22 = vpop.f32.mrf.mxu0 }
 0x38b   : > { %v635_v24 = vpop.f32.mrf.mxu1  ;;  %v605_v30 = vadd.f32 %v604_v22, %v563_v27 }
 0x38c   : > { %v636_v26 = vadd.f32 %v635_v24, %v597_v25 }
 0x38e   : > { %v666_v20 = vadd.f32 %v665_v19, %v636_v26 }
 0x390   : > { %v696_v34 = vadd.f32 %v695_v21, %v666_v20 }
 0x392   : > { %v670_v29 = vpop.f32.mrf.mxu2  ;;  %v728_v32 = vpop.f32.mrf.mxu0 }
 0x393   : > { %v639_v28 = vpop.f32.mrf.mxu1  ;;  %v701_v33 = vpop.f32.mrf.mxu3  ;;  %v729_v35 = vadd.f32 %v728_v32, %v696_v34 }
 0x394   : > { %v640_v61 = vadd.f32 %v639_v28, %v605_v30 }
 0x396   : > { %v671_v39 = vadd.f32 %v670_v29, %v640_v61 }
 0x398   : > { %v702_v40 = vadd.f32 %v701_v33, %v671_v39 }
 0x39a   : > { %v786_v38 = vpop.f32.mrf.mxu2  ;;  %v732_v41 = vpop.f32.mrf.mxu0 }
 0x39b   : > { %v755_v36 = vpop.f32.mrf.mxu1  ;;  %v825_v42 = vpop.f32.mrf.mxu3  ;;  %v733_v47 = vadd.f32 %v732_v41, %v702_v40  ;;  %v787_v12 = vadd.f32 %v786_v38, %v559_v17 }
 0x39c   : > { %v1902_v23 = vadd.f32 %v755_v36, %v729_v35 }
 0x39d   : > { %v826_v31 = vadd.f32 %v825_v42, %v787_v12 }
 0x39e   : > { %v1905_v7 = vmul.f32 0.70710677, %v1902_v23 }
 0x3a0   : > { %v968_v44 = vand.u32 2147483647, %v1905_v7  ;;  %vm960_vm4 = vcmp.ge.f32.partialorder %v1905_v7, 0.0  ;;  %v151_v7 = vld [vmem:[%s2056_s1 + $0x28] sm:$0xff] }
 0x3a2   : > { %v972_v54 = vmul.f32 0.3275911, %v968_v44  ;;  %v794_v55 = vpop.f32.mrf.mxu2  ;;  %v855_v43 = vpop.f32.mrf.mxu0  ;;  %v1076_v26 = vsub.f32 0.0, %v968_v44 }
 0x3a3   : > { %v759_v18 = vpop.f32.mrf.mxu1  ;;  %v829_v45 = vpop.f32.mrf.mxu3  ;;  %v856_v49 = vadd.f32 %v855_v43, %v826_v31  ;;  %v795_v53 = vadd.f32 %v794_v55, %v563_v27 }
 0x3a4   : > { %v976_v56 = vadd.f32 1.0, %v972_v54  ;;  %v1908_v13 = vadd.f32 %v759_v18, %v733_v47  ;;  %v1080_v35 = vmul.f32 %v1076_v26, %v968_v44 }
 0x3a5   : > { %v830_v9 = vadd.f32 %v829_v45, %v795_v53 }
 0x3a6   : > { %1643 = vrcp.f32 %v976_v56  ;;  %v1911_v57 = vmul.f32 0.70710677, %v1908_v13  ;;  %v991_v8 = vand.u32 2147483648, %v976_v56  ;;  %v989_v37 = vand.u32 2147483647, %v976_v56 }
 0x3a7   : > { %vm985_vm11 = vweird.f32 %v976_v56  ;;  %v1084_v55 = vmul.f32 1.442695, %v1080_v35 }
 0x3a8   : > { %v1914_v58 = vand.u32 2147483647, %v1911_v57  ;;  %v992_v17 = vor.u32 1.1754944e-38, %v991_v8  ;;  %vm990_vm13 = vcmp.eq.f32.partialorder %v989_v37, 8.507059e+37  ;;  %vm962_vm9 = vcmp.ge.f32.partialorder %v1911_v57, 0.0 }
 0x3aa   : > { %v974_v51 = vmul.f32 0.3275911, %v1914_v58  ;;  %v918_v63 = vpop.f32.mrf.mxu2  ;;  %v860_v6 = vpop.f32.mrf.mxu0  ;;  %v1078_v43 = vsub.f32 0.0, %v1914_v58 }
 0x3ab   : > { %v885_v50 = vpop.f32.mrf.mxu1  ;;  %v945_v1 = vpop.f32.mrf.mxu3  ;;  %v861_v14 = vadd.f32 %v860_v6, %v830_v9 }
 0x3ac   : > { %v1644_v52 = vpop.eup %1643  ;;  %v886_v0 = vadd.f32 %v885_v50, %v856_v49  ;;  %v978_v2 = vadd.f32 1.0, %v974_v51 }
 0x3ad   : > { %v981_v3 = vmul.f32 %v1644_v52, %v976_v56  ;;  %vm986_vm10 = vweird.f32 %v1644_v52 }
 0x3ae   : > { %v919_v4 = vadd.f32 %v918_v63, %v886_v0  ;;  %1645 = vrcp.f32 %v978_v2  ;;  %vm987_vm12 = vmor %vm985_vm11, %vm986_vm10  ;;  %v1021_v36 = vand.u32 2147483648, %v978_v2  ;;  %v1019_v41 = vand.u32 2147483647, %v978_v2 }
 0x3af   : > { %v982_v5 = vsub.f32 1.0, %v981_v3  ;;  %vm1015_vm15 = vweird.f32 %v978_v2 }
 0x3b0   : > { %v1917_v10 = vadd.f32 %v945_v1, %v919_v4  ;;  %v1022_v18 = vor.u32 1.1754944e-38, %v1021_v36  ;;  %vm1020_vm1 = vcmp.eq.f32.partialorder %v1019_v41, 8.507059e+37  ;;  %v1082_v1 = vmul.f32 %v1078_v43, %v1914_v58 }
 0x3b1   : > { %v983_v11 = vmul.f32 %v1644_v52, %v982_v5 }
 0x3b2   : > { %v1920_v46 = vmul.f32 0.70710677, %v1917_v10  ;;  %v922_v22 = vpop.f32.mrf.mxu2 }
 0x3b3   : > { %v984_v15 = vadd.f32 %v1644_v52, %v983_v11  ;;  %v891_v16 = vpop.f32.mrf.mxu1  ;;  %v949_v20 = vpop.f32.mrf.mxu3  ;;  %v150_v11 = vld [vmem:[%s2056_s1 + $0x20] sm:$0xff] }
 0x3b4   : > { %v1923_v19 = vand.u32 2147483647, %v1920_v46  ;;  %v892_v21 = vadd.f32 %v891_v16, %v861_v14  ;;  %v1646_v24 = vpop.eup %1645  ;;  %v1088_v14 = vmul.f32 1.442695, %v1082_v1  ;;  %v1124_v1 = vsel %vm565_vm6, %v151_v7, 0 }
 0x3b5   : > { %v988_v25 = vsel %vm987_vm12, %v1644_v52, %v984_v15  ;;  %v1011_v28 = vmul.f32 %v1646_v24, %v978_v2  ;;  %vm1016_vm14 = vweird.f32 %v1646_v24 }
 0x3b6   : > { %v993_v27 = vsel %vm990_vm13, %v992_v17, %v988_v25  ;;  %v973_v29 = vmul.f32 0.3275911, %v1923_v19  ;;  %v923_v32 = vadd.f32 %v922_v22, %v892_v21  ;;  %vm1017_vm0 = vmor %vm1015_vm15, %vm1016_vm14  ;;  %v1077_v21 = vsub.f32 0.0, %v1923_v19 }
 0x3b7   : > { %v1040_v30 = vmul.f32 1.0614054, %v993_v27  ;;  %v1012_v33 = vsub.f32 1.0, %v1011_v28  ;;  %v1121_v25 = vsel %vm565_vm6, %v150_v11, 0  ;;  %vm961_vm6 = vcmp.ge.f32.partialorder %v1920_v46, 0.0 }
 0x3b8   : > { %v977_v34 = vadd.f32 1.0, %v973_v29  ;;  %v1926_v38 = vadd.f32 %v949_v20, %v923_v32  ;;  %v1686_v32 = vmov -1.0  }
 0x3b9   : > { %v1044_v61 = vadd.f32 -1.4531521, %v1040_v30  ;;  %v1013_v39 = vmul.f32 %v1646_v24, %v1012_v33  ;;  %v964_v33 = vsel %vm960_vm4, 1.0, %v1686_v32 }
 0x3ba   : > { %1647 = vrcp.f32 %v977_v34  ;;  %v1929_v47 = vmul.f32 0.70710677, %v1926_v38  ;;  %v1006_v4 = vand.u32 2147483648, %v977_v34  ;;  %v1004_v8 = vand.u32 2147483647, %v977_v34 }
 0x3bb   : > { %v1048_v42 = vmul.f32 %v1044_v61, %v993_v27  ;;  %v1014_v40 = vadd.f32 %v1646_v24, %v1013_v39  ;;  %1649 = vpow2.f32 %v1084_v55  ;;  %vm1000_vm3 = vweird.f32 %v977_v34 }
 0x3bc   : > { %v1932_v44 = vand.u32 2147483647, %v1929_v47  ;;  %v1007_v17 = vor.u32 1.1754944e-38, %v1006_v4  ;;  %vm1005_vm7 = vcmp.eq.f32.partialorder %v1004_v8, 8.507059e+37  ;;  %v1953_v61 = vand.u32 4294901760, %v1121_v25 }
 0x3bd   : > { %v1052_v54 = vadd.f32 1.4214138, %v1048_v42  ;;  %v1018_v56 = vsel %vm1017_vm0, %v1646_v24, %v1014_v40  ;;  %v1081_v39 = vmul.f32 %v1077_v21, %v1923_v19  ;;  %vm963_vm13 = vcmp.ge.f32.partialorder %v1929_v47, 0.0 }
 0x3be   : > { %v1023_v45 = vsel %vm1020_vm1, %v1022_v18, %v1018_v56  ;;  %v975_v51 = vmul.f32 0.3275911, %v1932_v44  ;;  %v1965_v43 = vsub.f32 %v1121_v25, %v1953_v61  ;;  %v1079_v4 = vsub.f32 0.0, %v1932_v44 }
 0x3bf   : > { %v1056_v12 = vmul.f32 %v1052_v54, %v993_v27  ;;  %v1042_v49 = vmul.f32 1.0614054, %v1023_v45 }
 0x3c0   : > { %v1648_v31 = vpop.eup %1647  ;;  %v1936_v53 = vadd.f32 1.0, %v975_v51  ;;  %v1086_v51 = vmul.f32 1.442695, %v1081_v39 }
 0x3c1   : > { %v1060_v50 = vadd.f32 -0.28449672, %v1056_v12  ;;  %v996_v63 = vmul.f32 %v1648_v31, %v977_v34  ;;  %v1046_v52 = vadd.f32 -1.4531521, %v1042_v49  ;;  %vm1001_vm2 = vweird.f32 %v1648_v31  ;;  %v1650_v16 = vpop.eup %1649 }
 0x3c2   : > { %1651 = vrcp.f32 %v1936_v53  ;;  %vm1002_vm5 = vmor %vm1000_vm3, %vm1001_vm2  ;;  %v1034_v40 = vand.u32 2147483647, %v1936_v53  ;;  %v1036_v54 = vand.u32 2147483648, %v1936_v53  ;;  %v952_v12 = vmul.f32 0.5, %v1902_v23 }
 0x3c3   : > { %v1064_v0 = vmul.f32 %v1060_v50, %v993_v27  ;;  %v997_v3 = vsub.f32 1.0, %v996_v63  ;;  %v1050_v2 = vmul.f32 %v1046_v52, %v1023_v45  ;;  %1653 = vpow2.f32 %v1088_v14 }
 0x3c4   : > { %vm1030_vm10 = vweird.f32 %v1936_v53  ;;  %vm1035_vm12 = vcmp.eq.f32.partialorder %v1034_v40, 8.507059e+37  ;;  %1655 = vpow2.f32 %v1086_v51 }
 0x3c5   : > { %v1068_v5 = vadd.f32 0.2548296, %v1064_v0  ;;  %v998_v6 = vmul.f32 %v1648_v31, %v997_v3  ;;  %v1054_v9 = vadd.f32 1.4214138, %v1050_v2  ;;  %v1037_v0 = vor.u32 1.1754944e-38, %v1036_v54 }
 0x3c7   : > { %v1072_v37 = vmul.f32 %v1068_v5, %v993_v27  ;;  %v999_v15 = vadd.f32 %v1648_v31, %v998_v6  ;;  %v1058_v58 = vmul.f32 %v1054_v9, %v1023_v45  ;;  %v1974_v5 = vand.u32 4294901760, %v1965_v43 }
 0x3c8   : > { %v1652_v26 = vpop.eup %1651  ;;  %v1980_v9 = vand.u32 4294901760, %v1124_v1 }
 0x3c9   : > { %v1092_v22 = vmul.f32 %v1650_v16, %v1072_v37  ;;  %v1003_v24 = vsel %vm1002_vm5, %v1648_v31, %v999_v15  ;;  %v1062_v28 = vadd.f32 -0.28449672, %v1058_v58  ;;  %v1026_v30 = vmul.f32 %v1652_v26, %v1936_v53  ;;  %v1654_v31 = vpop.eup %1653 }
 0x3ca   : > { %v1946_v29 = vsel %vm1005_vm7, %v1007_v17, %v1003_v24  ;;  %vm1031_vm8 = vweird.f32 %v1652_v26  ;;  %v966_v53 = vsel %vm962_vm9, 1.0, %v1686_v32  ;;  %v954_v16 = vmul.f32 0.5, %v1908_v13 }
 0x3cb   : > { %v1096_v27 = vsub.f32 1.0, %v1092_v22  ;;  %v1041_v20 = vmul.f32 1.0614054, %v1946_v29  ;;  %v1066_v34 = vmul.f32 %v1062_v28, %v1023_v45  ;;  %v1027_v41 = vsub.f32 1.0, %v1026_v30  ;;  %vm1032_vm11 = vmor %vm1030_vm10, %vm1031_vm8  ;;  %v1656_v30 = vpop.eup %1655 }
 0x3cc   : > { %v1083_v17 = vmul.f32 %v1079_v4, %v1932_v44  ;;  %v1147_v57 = vsub.f32 %v1965_v43, %v1974_v5  ;;  %v1991_v24 = vsub.f32 %v1124_v1, %v1980_v9  ;;  %v1687_v28 = vmov 16   ;;  %v1659_v44 = vld [vmem:[%s2056_s1] sm:$0xff] }
 0x3cd   : > { %v1100_v35 = vmul.f32 %v1096_v27, %v964_v33  ;;  %v1045_v36 = vadd.f32 -1.4531521, %v1041_v20  ;;  %v1070_v42 = vadd.f32 0.2548296, %v1066_v34  ;;  %v1028_v56 = vmul.f32 %v1652_v26, %v1027_v41  ;;  %1636 = vset.pattern.permute.xlu1 %v1687_v28  ;;  %1637 = vset.pattern.permute.xlu2 %v1687_v28  ;;  %v1660_v20 = vld [vmem:[%s2056_s1 + $0x8] sm:$0xff] }
 0x3ce   : > { %1113 = vperm.xlu1 %1636, %v1659_v44   ;;  %1117 = vperm.xlu2 %1637, %v1660_v20   ;;  %v1090_v34 = vmul.f32 1.442695, %v1083_v17  ;;  %v2004_v39 = vand.u32 4294901760, %v1991_v24  ;;  %v967_v4 = vsel %vm963_vm13, 1.0, %v1686_v32 }
 0x3cf   : > { %v1104_v18 = vadd.f32 1.0, %v1100_v35  ;;  %v1049_v55 = vmul.f32 %v1045_v36, %v1946_v29  ;;  %v1074_v19 = vmul.f32 %v1070_v42, %v1023_v45  ;;  %v1029_v50 = vadd.f32 %v1652_v26, %v1028_v56  ;;  %1638 = vset.pattern.permute.xlu0 %v1687_v28 }
 0x3d0   : > { %v1148_v36 = vand.u32 4294901760, %v1147_v57  ;;  %1657 = vpow2.f32 %v1090_v34  ;;  %v1155_v7 = vsub.f32 %v1991_v24, %v2004_v39 }
 0x3d1   : > { %v1053_v49 = vadd.f32 1.4214138, %v1049_v55  ;;  %v1108_v63 = vmul.f32 %v1104_v18, %v952_v12  ;;  %v1094_v52 = vmul.f32 %v1654_v31, %v1074_v19  ;;  %v1033_v3 = vsel %vm1032_vm11, %v1652_v26, %v1029_v50 }
 0x3d2   : > { %v1970_v2 = vsel %vm1035_vm12, %v1037_v0, %v1033_v3  ;;  %v965_v18 = vsel %vm961_vm6, 1.0, %v1686_v32  ;;  %v953_v50 = vmul.f32 0.5, %v1917_v10 }
 0x3d3   : > { %v1057_v23 = vmul.f32 %v1053_v49, %v1946_v29  ;;  %v1098_v45 = vsub.f32 1.0, %v1094_v52  ;;  %v1043_v8 = vmul.f32 1.0614054, %v1970_v2  ;;  %v1982_v11 = vand.u32 4294901760, %v1108_v63 }
 0x3d4   : > { %v1156_v52 = vand.u32 4294901760, %v1155_v7 }
 0x3d5   : > { %v1061_v6 = vadd.f32 -0.28449672, %v1057_v23  ;;  %v1102_v37 = vmul.f32 %v1098_v45, %v966_v53  ;;  %v1047_v15 = vadd.f32 -1.4531521, %v1043_v8  ;;  %v1182_v26 = vsub.f32 %v1108_v63, %v1982_v11 }
 0x3d6   : > { %v1658_v0 = vpop.eup %1657 }
 0x3d7   : > { %v1065_v14 = vmul.f32 %v1061_v6, %v1946_v29  ;;  %v1106_v58 = vadd.f32 1.0, %v1102_v37  ;;  %v1051_v22 = vmul.f32 %v1047_v15, %v1970_v2  ;;  %v1183_v42 = vand.u32 4294901760, %v1182_v26 }
 0x3d9   : > { %v1069_v21 = vadd.f32 0.2548296, %v1065_v14  ;;  %v1110_v25 = vmul.f32 %v1106_v58, %v954_v16  ;;  %v1055_v27 = vadd.f32 1.4214138, %v1051_v22  ;;  %v1184_v19 = vsub.f32 %v1182_v26, %v1183_v42 }
 0x3db   : > { %v1073_v13 = vmul.f32 %v1069_v21, %v1946_v29  ;;  %v1140_v33 = vand.u32 4294901760, %v1110_v25  ;;  %v1059_v29 = vmul.f32 %v1055_v27, %v1970_v2  ;;  %v1185_v1 = vand.u32 4294901760, %v1184_v19 }
 0x3dd   : > { %v1093_v35 = vmul.f32 %v1656_v30, %v1073_v13  ;;  %v1176_v41 = vsub.f32 %v1110_v25, %v1140_v33  ;;  %1141 = vmatpush.msrb.mxu0 %v1140_v33  ;;  %1242 = vmatpush.msrb.mxu3 %v1140_v33  ;;  %v1063_v54 = vadd.f32 -0.28449672, %v1059_v29 }
 0x3df   : > { %v1097_v40 = vsub.f32 1.0, %v1093_v35  ;;  %1143 = vmatpush.msrb.mxu0 %v1982_v11  ;;  %1212 = vmatpush.msrb.mxu2 %v1176_v41  ;;  %v1177_v46 = vand.u32 4294901760, %v1176_v41  ;;  %v1067_v56 = vmul.f32 %v1063_v54, %v1970_v2 }
 0x3e0   : > { %1244 = vmatpush.msrb.mxu3 %v1982_v11  ;;  %1149 = vmatmul.f32.vlgmr.msrb.gmra.mxu0 %v1148_v36 }
 0x3e1   : > { %v1101_v55 = vmul.f32 %v1097_v40, %v965_v18  ;;  %1215 = vmatpush.msrb.mxu2 %v1182_v26  ;;  %1275 = vmatpush.msra.mxu0 %v1177_v46  ;;  %v1178_v12 = vsub.f32 %v1176_v41, %v1177_v46  ;;  %v1071_v49 = vadd.f32 0.2548296, %v1067_v56 }
 0x3e2   : > { %1218 = vmatmul.f32.vlgmr.msrb.gmra.mxu2 %v1965_v43  ;;  %1248 = vmatmul.f32.vlgmr.msrb.gmra.mxu3 %v1974_v5 }
 0x3e3   : > { %v1105_v31 = vadd.f32 1.0, %v1101_v55  ;;  %1279 = vmatpush.msra.mxu0 %v1183_v42  ;;  %v1179_v51 = vand.u32 4294901760, %v1178_v12  ;;  %v1075_v63 = vmul.f32 %v1071_v49, %v1970_v2  ;;  %v955_v2 = vmul.f32 0.5, %v1926_v38 }
 0x3e5   : > { %1180 = vmatpush.msrb.mxu1 %v1179_v51  ;;  %v1109_v23 = vmul.f32 %v1105_v31, %v953_v50  ;;  %v1095_v3 = vmul.f32 %v1658_v0, %v1075_v63 }
 0x3e7   : > { %1186 = vmatpush.msrb.mxu1 %v1185_v1  ;;  %v1099_v45 = vsub.f32 1.0, %v1095_v3  ;;  %v1332_v53 = vand.u32 4294901760, %v1109_v23 }
 0x3e8   : > { %1188 = vmatmul.f32.vlgmr.msrb.gmra.mxu1 %v1953_v61  ;;  %1157 = vmatmul.f32.gmra.mxu0 %v1156_v52 }
 0x3e9   : > { %1304 = vmatpush.msra.mxu1 %v1140_v33  ;;  %v1103_v10 = vmul.f32 %v1099_v45, %v967_v4  ;;  %v1372_v8 = vsub.f32 %v1109_v23, %v1332_v53 }
 0x3ea   : > { %1223 = vmatmul.f32.gmra.mxu2 %v1991_v24  ;;  %1254 = vmatmul.f32.gmra.mxu3 %v2004_v39 }
 0x3eb   : > { %1306 = vmatpush.msra.mxu1 %v1982_v11  ;;  %v1107_v47 = vadd.f32 1.0, %v1103_v10  ;;  %v1373_v14 = vand.u32 4294901760, %v1372_v8 }
 0x3ed   : > { %v1111_v6 = vmul.f32 %v1107_v47, %v955_v2  ;;  %v1374_v11 = vsub.f32 %v1372_v8, %v1373_v14 }
 0x3ef   : > { %v1330_v37 = vand.u32 4294901760, %v1111_v6  ;;  %v1375_v58 = vand.u32 4294901760, %v1374_v11 }
 0x3f0   : > { %1192 = vmatmul.f32.gmra.mxu1 %v1980_v9  ;;  %1281 = vmatmul.f32.vlgmr.msra.gmra.mxu0 %v1953_v61 }
 0x3f1   : > { %v1366_v32 = vsub.f32 %v1111_v6, %v1330_v37  ;;  %1331 = vmatpush.msra.mxu2 %v1330_v37  ;;  %1432 = vmatpush.msrb.mxu1 %v1330_v37 }
 0x3f3   : > { %1333 = vmatpush.msra.mxu2 %v1332_v53  ;;  %1402 = vmatpush.msrb.mxu0 %v1366_v32  ;;  %v1367_v15 = vand.u32 4294901760, %v1366_v32 }
 0x3f4   : > { %1434 = vmatpush.msrb.mxu1 %v1332_v53  ;;  %1339 = vmatmul.f32.vlgmr.msra.gmra.mxu2 %v1148_v36 }
 0x3f5   : > { %1405 = vmatpush.msrb.mxu0 %v1372_v8  ;;  %1465 = vmatpush.msrb.mxu2 %v1367_v15  ;;  %v1368_v38 = vsub.f32 %v1366_v32, %v1367_v15 }
 0x3f7   : > { %1469 = vmatpush.msrb.mxu2 %v1373_v14  ;;  %v1369_v16 = vand.u32 4294901760, %v1368_v38 }
 0x3f8   : > { %1308 = vmatmul.f32.vlgmr.msra.gmra.mxu1 %v1953_v61  ;;  %1285 = vmatmul.f32.gmra.mxu0 %v1980_v9 }
 0x3f9   : > { %1370 = vmatpush.msra.mxu3 %v1369_v16 }
 0x3fb   : > { %1376 = vmatpush.msra.mxu3 %v1375_v58 }
 0x3fc   : > { %1378 = vmatmul.f32.vlgmr.msra.gmra.mxu3 %v1953_v61  ;;  %1347 = vmatmul.f32.gmra.mxu2 %v1156_v52 }
 0x3fd   : > { %1494 = vmatpush.msrb.mxu3 %v1330_v37 }
 0x3ff   : > { %1496 = vmatpush.msrb.mxu3 %v1332_v53 }
 0x400   : > { %1312 = vmatmul.f32.gmra.mxu1 %v1980_v9  ;;  %1408 = vmatmul.f32.vlgmr.msrb.gmra.mxu0 %v1965_v43 }
 0x404   : > { %1382 = vmatmul.f32.gmra.mxu3 %v1980_v9  ;;  %1471 = vmatmul.f32.vlgmr.msrb.gmra.mxu2 %v1953_v61 }
 0x408   : > { %1438 = vmatmul.f32.vlgmr.msrb.gmra.mxu1 %v1974_v5  ;;  %1413 = vmatmul.f32.gmra.mxu0 %v1991_v24 }
 0x40c   : > { %1498 = vmatmul.f32.vlgmr.msrb.gmra.mxu3 %v1953_v61  ;;  %1475 = vmatmul.f32.gmra.mxu2 %v1980_v9 }
 0x410   : > { %1444 = vmatmul.f32.gmra.mxu1 %v2004_v39 }
 0x414   : > { %1502 = vmatmul.f32.gmra.mxu3 %v1980_v9 }
 0x428   : > { %v1118_v28 = vpop.permute.xlu2 %1117 }
 0x440   : > { %v1114_v57 = vpop.permute.xlu1 %1113 }
 0x45d   : > { %v1150_v17 = vpop.f32.mrf.mxu0 }
 0x45e   : > { %v1151_v21 = vadd.f32 %v1150_v17, %v1114_v57 }
 0x465   : > { %v1189_v43 = vpop.f32.mrf.mxu1  ;;  %v1158_v22 = vpop.f32.mrf.mxu0 }
 0x466   : > { %v1219_v25 = vpop.f32.mrf.mxu2  ;;  %v1190_v26 = vadd.f32 %v1189_v43, %v1151_v21  ;;  %v1249_v5 = vpop.f32.mrf.mxu3  ;;  %v1159_v24 = vadd.f32 %v1158_v22, %v1118_v28 }
 0x468   : > { %v1220_v13 = vadd.f32 %v1219_v25, %v1190_v26 }
 0x46a   : > { %v1250_v20 = vadd.f32 %v1249_v5, %v1220_v13 }
 0x46d   : > { %v1193_v27 = vpop.f32.mrf.mxu1  ;;  %v1282_v44 = vpop.f32.mrf.mxu0 }
 0x46e   : > { %v1224_v61 = vpop.f32.mrf.mxu2  ;;  %v1194_v30 = vadd.f32 %v1193_v27, %v1159_v24  ;;  %v1283_v33 = vadd.f32 %v1282_v44, %v1250_v20  ;;  %v1255_v35 = vpop.f32.mrf.mxu3 }
 0x470   : > { %v1225_v34 = vadd.f32 %v1224_v61, %v1194_v30 }
 0x472   : > { %v1256_v39 = vadd.f32 %v1255_v35, %v1225_v34 }
 0x475   : > { %v1309_v9 = vpop.f32.mrf.mxu1  ;;  %v1286_v42 = vpop.f32.mrf.mxu0 }
 0x476   : > { %v1310_v29 = vadd.f32 %v1309_v9, %v1283_v33  ;;  %v1287_v40 = vadd.f32 %v1286_v42, %v1256_v39 }
 0x477   : > { %v1340_v41 = vpop.f32.mrf.mxu2 }
 0x478   : > { %v1506_v36 = vadd.f32 %v1310_v29, %v1836_v59  ;;  %v1341_v7 = vadd.f32 %v1340_v41, %v1114_v57 }
 0x47a   : > { %1510 = vst [vmem:[%s2042_s11] sm:$0xff] %v1506_v36 }
 0x47d   : > { %v1313_v54 = vpop.f32.mrf.mxu1  ;;  %v1409_v12 = vpop.f32.mrf.mxu0 }
 0x47e   : > { %v1314_v18 = vadd.f32 %v1313_v54, %v1287_v40 }
 0x47f   : > { %v1379_v55 = vpop.f32.mrf.mxu3  ;;  %v1348_v56 = vpop.f32.mrf.mxu2 }
 0x480   : > { %v1508_v46 = vadd.f32 %v1314_v18, %v1840_v62  ;;  %v1380_v19 = vadd.f32 %v1379_v55, %v1341_v7  ;;  %v1349_v51 = vadd.f32 %v1348_v56, %v1118_v28 }
 0x482   : > { %1512 = vst [vmem:[%s2042_s11 + $0x10] sm:$0xff] %v1508_v46  ;;  %v1410_v59 = vadd.f32 %v1409_v12, %v1380_v19 }
 0x485   : > { %v1439_v31 = vpop.f32.mrf.mxu1  ;;  %v1414_v0 = vpop.f32.mrf.mxu0 }
 0x486   : > { %v1440_v63 = vadd.f32 %v1439_v31, %v1410_v59 }
 0x487   : > { %v1383_v49 = vpop.f32.mrf.mxu3  ;;  %v1472_v50 = vpop.f32.mrf.mxu2 }
 0x488   : > { %v1384_v52 = vadd.f32 %v1383_v49, %v1349_v51  ;;  %v1473_v1 = vadd.f32 %v1472_v50, %v1440_v63 }
 0x48a   : > { %v1415_v45 = vadd.f32 %v1414_v0, %v1384_v52 }
 0x48d   : > { %v1445_v3 = vpop.f32.mrf.mxu1 }
 0x48e   : > { %v1446_v53 = vadd.f32 %v1445_v3, %v1415_v45 }
 0x48f   : > { %v1499_v23 = vpop.f32.mrf.mxu3  ;;  %v1476_v10 = vpop.f32.mrf.mxu2 }
 0x490   : > { %v1500_v62 = vadd.f32 %v1499_v23, %v1473_v1  ;;  %v1477_v2 = vadd.f32 %v1476_v10, %v1446_v53 }
 0x492   : > { %v1507_v4 = vadd.f32 %v1500_v62, %v1838_v60 }
 0x494   : > { %1511 = vst [vmem:[%s2042_s11 + $0x8] sm:$0xff] %v1507_v4 }
 0x497   : > { %v1503_v47 = vpop.f32.mrf.mxu3 }
 0x498   : > { %v1504_v6 = vadd.f32 %v1503_v47, %v1477_v2 }
 0x49a   : > { %v1509_v8 = vadd.f32 %v1504_v6, %v1842_v48 }
 0x49c   : > { %1513 = vst [vmem:[%s2042_s11 + $0x18] sm:$0xff] %v1509_v8 }
 0x49d PF: > { %s12_s9 = sadd.s32 1, %s1667_s9  }
 0x49e   : > { %p9_p4 = scmp.ge.s32.totalorder %s12_s9, 4  }
 0x4a0   :  { %11 = sbr.rel (!%p9_p4) target bundleno = 1 (0x1), region = 60 }

</bundles_post_ra>
